<compile_context>
chip_gen: v6e
topology: v6e:2x2x1
jax: 0.10.0
libtpu: 0.0.40
codegen_flags: <defaults>
</compile_context>

<pallas_src>
import functools

import jax
import jax.numpy as jnp
from jax import lax
from jax.experimental import pallas as pl
from jax.experimental.pallas import tpu as pltpu

FP = 128  # lane-dense padded feature width (in/hid/out all padded to 128)


def _round_up(x, m):
    return ((x + m - 1) // m) * m


def _plan_tiles(n):
    """Row tile, K tile and padded node count for the Ahat contraction.

    Tiles are sized so double-buffered bf16 blocks stay well under v7x's
    64 MiB VMEM while still being big enough to hide the HBM stream.
    """
    if n <= 128:
        tm, tk = 128, 128
    elif n <= 256:
        tm, tk = 256, 256
    else:
        tm, tk = 256, 512          # Ahat tile = 256x512 bf16 = 256 KiB (x2 buffers)
    n_pad = _round_up(n, max(tm, tk))
    return tm, tk, n_pad


def _pad2(a, r, c):
    return jnp.pad(a, ((0, r - a.shape[0]), (0, c - a.shape[1])))


# ---------------------------------------------------------------------------
# GraphConv kernels
# ---------------------------------------------------------------------------
def _xw_kernel(x_ref, w_ref, o_ref):
    # X @ W computed once per layer (hoisted out of the Ahat-tiled contraction).
    o_ref[...] = jnp.dot(x_ref[...], w_ref[...],
                         preferred_element_type=jnp.float32).astype(o_ref.dtype)


def feature_transform(x_pad, w_pad, tm):
    n_pad = x_pad.shape[0]
    return pl.pallas_call(
        _xw_kernel,
        out_shape=jax.ShapeDtypeStruct((n_pad, FP), jnp.bfloat16),
        grid=(n_pad // tm,),
        in_specs=[pl.BlockSpec((tm, FP), lambda i: (i, 0)),
                  pl.BlockSpec((FP, FP), lambda i: (0, 0))],
        out_specs=pl.BlockSpec((tm, FP), lambda i: (i, 0)),
        compiler_params=pltpu.CompilerParams(dimension_semantics=("parallel",)),
    )(x_pad.astype(jnp.bfloat16), w_pad.astype(jnp.bfloat16))


def _aggregate_kernel(ahat_ref, xw_ref, b_ref, o_ref, acc_ref, *, relu):
    k = pl.program_id(1)

    @pl.when(k == 0)
    def _():
        acc_ref[...] = jnp.zeros_like(acc_ref)

    # bf16 operands, f32 accumulation on the MXU.
    acc_ref[...] += jnp.dot(ahat_ref[...], xw_ref[...],
                            preferred_element_type=jnp.float32)

    @pl.when(k == pl.num_programs(1) - 1)
    def _():
        h = acc_ref[...] + b_ref[...]
        if relu:
            h = jnp.maximum(h, 0.0)
        o_ref[...] = h.astype(o_ref.dtype)


def gcn_aggregate(ahat_bf16, xw_bf16, b_pad, tm, tk, relu):
    n_pad = ahat_bf16.shape[0]
    b2 = b_pad.reshape(1, FP).astype(jnp.float32)
    grid_m = n_pad // tm
    cost = pl.CostEstimate(
        flops=2 * n_pad * n_pad * FP,
        transcendentals=0,
        bytes_accessed=n_pad * n_pad * 2 + grid_m * n_pad * FP * 2 + n_pad * FP * 4,
    )
    return pl.pallas_call(
        functools.partial(_aggregate_kernel, relu=relu),
        out_shape=jax.ShapeDtypeStruct((n_pad, FP), jnp.float32),
        grid=(grid_m, n_pad // tk),
        in_specs=[
            pl.BlockSpec((tm, tk), lambda i, k: (i, k)),   # Ahat tile
            pl.BlockSpec((tk, FP), lambda i, k: (k, 0)),   # XW K-slab
            pl.BlockSpec((1, FP), lambda i, k: (0, 0)),    # bias (lane-dense)
        ],
        out_specs=pl.BlockSpec((tm, FP), lambda i, k: (i, 0)),
        scratch_shapes=[pltpu.VMEM((tm, FP), jnp.float32)],
        compiler_params=pltpu.CompilerParams(
            dimension_semantics=("parallel", "arbitrary")),
        cost_estimate=cost,
    )(ahat_bf16, xw_bf16, b2)


# ---------------------------------------------------------------------------
# JJ_Norm kernels (fused grouped statistics, two passes over X)
# ---------------------------------------------------------------------------
def _jj_group_sum_kernel(x_ref, gid_ref, sum_ref):
    # Accumulate per-group feature sums: groups = (time,label) train groups + test.
    @pl.when(pl.program_id(0) == 0)
    def _():
        sum_ref[...] = jnp.zeros_like(sum_ref)

    tm = x_ref.shape[0]
    g_pad = sum_ref.shape[0]
    iota_g = lax.broadcasted_iota(jnp.int32, (tm, g_pad), 1)
    oh = (gid_ref[...] == iota_g).astype(jnp.float32)            # (tm, G)
    # oh^T @ x  -> (G, FP), contraction over the node axis of both operands.
    sum_ref[...] += lax.dot_general(oh, x_ref[...],
                                    (((0,), (0,)), ((), ())),
                                    preferred_element_type=jnp.float32)


def _jj_dev_kernel(x_ref, gid_ref, ttid_ref, mean_ref, ttm_ref, rsq_ref, msq_ref):
    # Gather per-node group means in-kernel and accumulate squared deviations
    # per time bucket (rows 0..T-1 = train times, row T = test set).
    @pl.when(pl.program_id(0) == 0)
    def _():
        rsq_ref[...] = jnp.zeros_like(rsq_ref)
        msq_ref[...] = jnp.zeros_like(msq_ref)

    tm = x_ref.shape[0]
    g_pad = mean_ref.shape[0]
    tt_pad = rsq_ref.shape[0]

    iota_g = lax.broadcasted_iota(jnp.int32, (tm, g_pad), 1)
    oh_g = (gid_ref[...] == iota_g).astype(jnp.float32)          # (tm, G)
    mean_u = jnp.dot(oh_g, mean_ref[...], preferred_element_type=jnp.float32)
    ttm_u = jnp.dot(oh_g, ttm_ref[...], preferred_element_type=jnp.float32)

    x = x_ref[...]
    d_res = (x - mean_u) ** 2          # residual dev (train) / test dev (test rows)
    d_mean = (mean_u - ttm_u) ** 2     # between-mean dev (zero for test rows)

    iota_t = lax.broadcasted_iota(jnp.int32, (tm, tt_pad), 1)
    oh_t = (ttid_ref[...] == iota_t).astype(jnp.float32)         # (tm, T+1)
    rsq_ref[...] += lax.dot_general(oh_t, d_res, (((0,), (0,)), ((), ())),
                                    preferred_element_type=jnp.float32)
    msq_ref[...] += lax.dot_general(oh_t, d_mean, (((0,), (0,)), ((), ())),
                                    preferred_element_type=jnp.float32)


def jj_norm(x_pad, gid, ttid, labels, times, num_time, num_label, split, tm):
    n_pad = x_pad.shape[0]
    T, L = num_time, num_label
    G = T * L + 1                        # train (t,l) groups + one test group
    g_pad = _round_up(G, 8)
    tt_pad = _round_up(T + 1, 8)
    grid = (n_pad // tm,)
    arb = pltpu.CompilerParams(dimension_semantics=("arbitrary",))

    # ---- pass 1: grouped feature sums in a single read of X -----------------
    group_sums = pl.pallas_call(
        _jj_group_sum_kernel,
        out_shape=jax.ShapeDtypeStruct((g_pad, FP), jnp.float32),
        grid=grid,
        in_specs=[pl.BlockSpec((tm, FP), lambda i: (i, 0)),
                  pl.BlockSpec((tm, 1), lambda i: (i, 0))],
        out_specs=pl.BlockSpec((g_pad, FP), lambda i: (0, 0)),
        compiler_params=arb,
    )(x_pad, gid)

    # ---- tiny O(N) scalar bookkeeping in plain JAX ---------------------------
    is_train = times < split
    w_train = is_train.astype(jnp.float32)
    cnt_tl = jnp.zeros((T * L,), jnp.float32).at[times * L + labels].add(w_train)
    cnt_tl = cnt_tl.reshape(T, L)
    cnt_t = jnp.zeros((T,), jnp.float32).at[times].add(w_train)
    test_cnt = jnp.sum(1.0 - w_train)

    train_sum = group_sums[:T * L].reshape(T, L, FP)
    train_mean = train_sum / jnp.maximum(1.0, cnt_tl)[:, :, None]
    train_time_mean = train_sum.sum(axis=1) / jnp.maximum(1.0, cnt_t)[:, None]
    test_mean = group_sums[T * L] / jnp.maximum(1.0, test_cnt)

    mean_table = jnp.zeros((g_pad, FP), jnp.float32)
    mean_table = mean_table.at[:T * L].set(train_mean.reshape(T * L, FP))
    mean_table = mean_table.at[T * L].set(test_mean)
    ttm_table = jnp.zeros((g_pad, FP), jnp.float32)
    ttm_table = ttm_table.at[:T * L].set(jnp.repeat(train_time_mean, L, axis=0))
    ttm_table = ttm_table.at[T * L].set(test_mean)

    # ---- pass 2: per-time deviation sums + test variance ---------------------
    rsq_feat, msq_feat = pl.pallas_call(
        _jj_dev_kernel,
        out_shape=(jax.ShapeDtypeStruct((tt_pad, FP), jnp.float32),
                   jax.ShapeDtypeStruct((tt_pad, FP), jnp.float32)),
        grid=grid,
        in_specs=[pl.BlockSpec((tm, FP), lambda i: (i, 0)),
                  pl.BlockSpec((tm, 1), lambda i: (i, 0)),
                  pl.BlockSpec((tm, 1), lambda i: (i, 0)),
                  pl.BlockSpec((g_pad, FP), lambda i: (0, 0)),
                  pl.BlockSpec((g_pad, FP), lambda i: (0, 0))],
        out_specs=(pl.BlockSpec((tt_pad, FP), lambda i: (0, 0)),
                   pl.BlockSpec((tt_pad, FP), lambda i: (0, 0))),
        compiler_params=arb,
    )(x_pad, gid, ttid, mean_table, ttm_table)

    rsq = rsq_feat[:T].sum(axis=1)
    msq = msq_feat[:T].sum(axis=1)
    test_var = rsq_feat[T].sum() / jnp.maximum(1.0, test_cnt - 1.0)

    in_split = jnp.arange(T) < split
    denom = jnp.maximum(1.0, cnt_t - 1.0)
    rsq = jnp.where(in_split, rsq / denom, rsq)
    msq = jnp.where(in_split, msq / denom, msq)

    alpha_sq = (test_var - msq) / jnp.maximum(1e-6, rsq)
    alpha = jnp.where(alpha_sq > 0, jnp.sqrt(jnp.maximum(alpha_sq, 0.0)), 0.0)
    alpha = jnp.where(in_split, alpha, 1.0)

    # ---- blend: single FMA per element, left to XLA (fuses with neighbours) --
    gid_c = jnp.clip(gid[:, 0], 0, g_pad - 1)
    mean_u = jnp.take(mean_table, gid_c, axis=0)
    is_train_pad = ttid[:, 0] < split
    coef = jnp.where(is_train_pad, alpha[jnp.clip(ttid[:, 0], 0, T - 1)], 1.0)[:, None]
    return coef * x_pad + (1.0 - coef) * mean_u


# ---------------------------------------------------------------------------
# GCN2 forward
# ---------------------------------------------------------------------------
def gcn2_forward(ahat, features, params, labels, times, num_time, num_label, split):
    n = ahat.shape[0]
    tm, tk, n_pad = _plan_tiles(n)
    T, L = num_time, num_label
    g_pad = _round_up(T * L + 1, 8)
    tt_pad = _round_up(T + 1, 8)

    # Pad everything to tile-aligned, lane-dense shapes.
    ahat_p = _pad2(ahat.astype(jnp.float32), n_pad, n_pad).astype(jnp.bfloat16)
    x_p = _pad2(features.astype(jnp.float32), n_pad, FP)
    w1 = _pad2(params["w1"].astype(jnp.float32), FP, FP)
    b1 = jnp.pad(params["b1"].astype(jnp.float32), (0, FP - params["b1"].shape[0]))
    w2 = _pad2(params["w2"].astype(jnp.float32), FP, FP)
    b2 = jnp.pad(params["b2"].astype(jnp.float32), (0, FP - params["b2"].shape[0]))

    # Per-node group ids (sentinel = out-of-range -> zero one-hot row in-kernel).
    valid = jnp.arange(n_pad) < n
    times_p = jnp.pad(times, (0, n_pad - n))
    labels_p = jnp.pad(labels, (0, n_pad - n))
    is_train_p = valid & (times_p < split)
    is_test_p = valid & (times_p >= split)
    gid = jnp.where(is_train_p, times_p * L + labels_p,
                    jnp.where(is_test_p, T * L, g_pad)).astype(jnp.int32)[:, None]
    ttid = jnp.where(is_train_p, times_p,
                     jnp.where(is_test_p, T, tt_pad)).astype(jnp.int32)[:, None]

    # layer 0: GraphConv(in -> hid, relu) + JJ_Norm
    xw = feature_transform(x_p, w1, tm)
    h = gcn_aggregate(ahat_p, xw, b1, tm, tk, relu=True)
    h = jj_norm(h, gid, ttid, labels, times, T, L, split, tm)

    # nn.Dropout(0.5): identity at inference.
    # TODO(synk): training-mode dropout (random masking) not implemented.

    # layer 1: GraphConv(hid -> out) + JJ_Norm
    xw = feature_transform(h, w2, tm)
    h = gcn_aggregate(ahat_p, xw, b2, tm, tk, relu=False)
    h = jj_norm(h, gid, ttid, labels, times, T, L, split, tm)

    out_size = params["w2"].shape[1]
    return h[:n, :out_size]


def xavier_uniform(key, shape):
    fan_in, fan_out = shape
    limit = (6.0 / (fan_in + fan_out)) ** 0.5
    return jax.random.uniform(key, shape, jnp.float32, -limit, limit)


# ---------------------------------------------------------------------------
if __name__ == "__main__":
    key = jax.random.PRNGKey(0)
    N, in_size, hid_size, out_size = 16, 8, 16, 4
    num_time, num_label, split = 4, 3, 2

    k1, k2, k3, k4, k5, k6 = jax.random.split(key, 6)
    features = jax.random.normal(k1, (N, in_size), jnp.float32)
    labels = jax.random.randint(k2, (N,), 0, num_label)
    times = jax.random.randint(k3, (N,), 0, num_time)

    # random symmetric graph with self-loops, symmetric ('both') GCN normalization
    a = jax.random.bernoulli(k4, 0.3, (N, N)).astype(jnp.float32)
    a = jnp.maximum(a, a.T)
    a = jnp.maximum(a, jnp.eye(N, dtype=jnp.float32))
    deg = a.sum(axis=1)
    dinv = 1.0 / jnp.sqrt(jnp.maximum(deg, 1.0))
    ahat = dinv[:, None] * a * dinv[None, :]

    params = dict(
        w1=xavier_uniform(k5, (in_size, hid_size)),
        b1=jnp.zeros((hid_size,), jnp.float32),
        w2=xavier_uniform(k6, (hid_size, out_size)),
        b2=jnp.zeros((out_size,), jnp.float32),
    )

    fwd = jax.jit(gcn2_forward, static_argnums=(5, 6, 7))
    out = fwd(ahat, features, params, labels, times, num_time, num_label, split)
    jax.block_until_ready(out)
    assert out.shape == (N, out_size)
    assert bool(jnp.all(jnp.isfinite(out)))
    print("KERNEL_OK")
</pallas_src>

<mosaic_0001>
module attributes {stable_mosaic.version = 11 : i64} {
  func.func private @main(%arg0: i32) attributes {dimension_semantics = [#tpu.dimension_semantics<core_parallel>], iteration_bounds = array<i64: 2>, tpu.core_type = #tpu.core_type<sc_scalar_subcore>, window_params = []} {
    return
  }
}

module attributes {stable_mosaic.version = 11 : i64} {
  func.func private @main(%arg0: i32) attributes {dimension_semantics = [#tpu.dimension_semantics<core_parallel>], iteration_bounds = array<i64: 2>, tpu.core_type = #tpu.core_type<sc_scalar_subcore>, window_params = []} {
    return
  }
}

module attributes {stable_mosaic.version = 11 : i64} {
  func.func @_xw_kernel(%arg0: i32, %arg1: memref<128x128xbf16, #tpu.memory_space<vmem>>, %arg2: memref<128x128xbf16, #tpu.memory_space<vmem>>, %arg3: memref<128x128xbf16, #tpu.memory_space<vmem>>) attributes {dimension_semantics = [#tpu.dimension_semantics<parallel>], iteration_bounds = array<i64: 1>, scalar_prefetch = 0 : i64, scratch_operands = 0 : i64, tpu.core_type = #tpu.core_type<tc>, window_params = [{transform_indices = @transform_0, window_bounds = array<i64: 128, 128>}, {pipeline_mode = #tpu.pipeline_mode<synchronous>, transform_indices = @transform_1, window_bounds = array<i64: 128, 128>}, {transform_indices = @transform_2, window_bounds = array<i64: 128, 128>}]} {
    %c0 = arith.constant 0 : index
    %c0_0 = arith.constant 0 : index
    %0 = vector.load %arg1[%c0, %c0_0] : memref<128x128xbf16, #tpu.memory_space<vmem>>, vector<128x128xbf16>
    %c0_1 = arith.constant 0 : index
    %c0_2 = arith.constant 0 : index
    %1 = vector.load %arg2[%c0_1, %c0_2] : memref<128x128xbf16, #tpu.memory_space<vmem>>, vector<128x128xbf16>
    %cst = arith.constant dense<0.000000e+00> : vector<128x128xf32>
    %2 = tpu.matmul %0, %1, %cst {dimension_numbers = #tpu.dot_dimension_numbers<[1], [0], [0], [1], [0, 0, 1, 1], [], []>} : vector<128x128xbf16>, vector<128x128xbf16>, vector<128x128xf32> -> vector<128x128xf32>
    %3 = arith.truncf %2 : vector<128x128xf32> to vector<128x128xbf16>
    %c0_3 = arith.constant 0 : index
    %c0_4 = arith.constant 0 : index
    %4 = vector.load %arg3[%c0_3, %c0_4] : memref<128x128xbf16, #tpu.memory_space<vmem>>, vector<128x128xbf16>
    tpu.vector_store %arg3[%c0_3, %c0_4], %3 {strides = array<i32>} : memref<128x128xbf16, #tpu.memory_space<vmem>>, vector<128x128xbf16>,
    return
  }
  func.func @transform_0(%arg0: i32) -> (i32, i32) {
    %c0_i32 = arith.constant 0 : i32
    %c0_i32_0 = arith.constant 0 : i32
    return %arg0, %c0_i32 : i32, i32
  }
  func.func @transform_1(%arg0: i32) -> (i32, i32) {
    %c0_i32 = arith.constant 0 : i32
    %c0_i32_0 = arith.constant 0 : i32
    %c0_i32_1 = arith.constant 0 : i32
    return %c0_i32, %c0_i32_0 : i32, i32
  }
  func.func @transform_2(%arg0: i32) -> (i32, i32) {
    %c0_i32 = arith.constant 0 : i32
    %c0_i32_0 = arith.constant 0 : i32
    return %arg0, %c0_i32 : i32, i32
  }
}

module attributes {stable_mosaic.version = 11 : i64} {
  func.func @_aggregate_kernel(%arg0: i32, %arg1: i32, %arg2: memref<128x128xbf16, #tpu.memory_space<vmem>>, %arg3: memref<128x128xbf16, #tpu.memory_space<vmem>>, %arg4: memref<1x128xf32, #tpu.memory_space<vmem>>, %arg5: memref<128x128xf32, #tpu.memory_space<vmem>>, %arg6: memref<128x128xf32, #tpu.memory_space<vmem>>) attributes {dimension_semantics = [#tpu.dimension_semantics<parallel>, #tpu.dimension_semantics<arbitrary>], iteration_bounds = array<i64: 1, 1>, scalar_prefetch = 0 : i64, scratch_operands = 1 : i64, tpu.core_type = #tpu.core_type<tc>, window_params = [{transform_indices = @transform_0, window_bounds = array<i64: 128, 128>}, {transform_indices = @transform_1, window_bounds = array<i64: 128, 128>}, {pipeline_mode = #tpu.pipeline_mode<synchronous>, transform_indices = @transform_2, window_bounds = array<i64: 1, 128>}, {transform_indices = @transform_3, window_bounds = array<i64: 128, 128>}]} {
    %c0_i32 = arith.constant 0 : i32
    %0 = arith.cmpi eq, %arg1, %c0_i32 : i32
    %1 = arith.extui %0 : i1 to i32
    %c0_i32_0 = arith.constant 0 : i32
    %2 = arith.cmpi ne, %1, %c0_i32_0 : i32
    scf.if %2 {
      %cst_10 = arith.constant 0.000000e+00 : f32
      %12 = vector.broadcast %cst_10 : f32 to vector<128x128xf32>
      %c0_11 = arith.constant 0 : index
      %c0_12 = arith.constant 0 : index
      %13 = vector.load %arg6[%c0_11, %c0_12] : memref<128x128xf32, #tpu.memory_space<vmem>>, vector<128x128xf32>
      tpu.vector_store %arg6[%c0_11, %c0_12], %12 {strides = array<i32>} : memref<128x128xf32, #tpu.memory_space<vmem>>, vector<128x128xf32>,
    } else {
    }
    %c0 = arith.constant 0 : index
    %c0_1 = arith.constant 0 : index
    %3 = vector.load %arg6[%c0, %c0_1] : memref<128x128xf32, #tpu.memory_space<vmem>>, vector<128x128xf32>
    %c0_2 = arith.constant 0 : index
    %c0_3 = arith.constant 0 : index
    %4 = vector.load %arg2[%c0_2, %c0_3] : memref<128x128xbf16, #tpu.memory_space<vmem>>, vector<128x128xbf16>
    %c0_4 = arith.constant 0 : index
    %c0_5 = arith.constant 0 : index
    %5 = vector.load %arg3[%c0_4, %c0_5] : memref<128x128xbf16, #tpu.memory_space<vmem>>, vector<128x128xbf16>
    %cst = arith.constant dense<0.000000e+00> : vector<128x128xf32>
    %6 = tpu.matmul %4, %5, %cst {dimension_numbers = #tpu.dot_dimension_numbers<[1], [0], [0], [1], [0, 0, 1, 1], [], []>} : vector<128x128xbf16>, vector<128x128xbf16>, vector<128x128xf32> -> vector<128x128xf32>
    %7 = arith.addf %3, %6 : vector<128x128xf32>
    %c0_6 = arith.constant 0 : index
    %c0_7 = arith.constant 0 : index
    %8 = vector.load %arg6[%c0_6, %c0_7] : memref<128x128xf32, #tpu.memory_space<vmem>>, vector<128x128xf32>
    tpu.vector_store %arg6[%c0_6, %c0_7], %7 {strides = array<i32>} : memref<128x128xf32, #tpu.memory_space<vmem>>, vector<128x128xf32>,
    %c0_i32_8 = arith.constant 0 : i32
    %9 = arith.cmpi eq, %arg1, %c0_i32_8 : i32
    %10 = arith.extui %9 : i1 to i32
    %c0_i32_9 = arith.constant 0 : i32
    %11 = arith.cmpi ne, %10, %c0_i32_9 : i32
    scf.if %11 {
      %c0_10 = arith.constant 0 : index
      %c0_11 = arith.constant 0 : index
      %12 = vector.load %arg6[%c0_10, %c0_11] : memref<128x128xf32, #tpu.memory_space<vmem>>, vector<128x128xf32>
      %c0_12 = arith.constant 0 : index
      %c0_13 = arith.constant 0 : index
      %13 = vector.load %arg4[%c0_12, %c0_13] : memref<1x128xf32, #tpu.memory_space<vmem>>, vector<1x128xf32>
      %14 = vector.broadcast %13 : vector<1x128xf32> to vector<128x128xf32>
      %15 = arith.addf %12, %14 : vector<128x128xf32>
      %cst_14 = arith.constant 0.000000e+00 : f32
      %16 = vector.broadcast %cst_14 : f32 to vector<128x128xf32>
      %17 = arith.maximumf %15, %16 : vector<128x128xf32>
      %c0_15 = arith.constant 0 : index
      %c0_16 = arith.constant 0 : index
      %18 = vector.load %arg5[%c0_15, %c0_16] : memref<128x128xf32, #tpu.memory_space<vmem>>, vector<128x128xf32>
      tpu.vector_store %arg5[%c0_15, %c0_16], %17 {strides = array<i32>} : memref<128x128xf32, #tpu.memory_space<vmem>>, vector<128x128xf32>,
    } else {
    }
    return
  }
  func.func @transform_0(%arg0: i32, %arg1: i32) -> (i32, i32) {
    %c0_i32 = arith.constant 0 : i32
    return %arg0, %arg1 : i32, i32
  }
  func.func @transform_1(%arg0: i32, %arg1: i32) -> (i32, i32) {
    %c0_i32 = arith.constant 0 : i32
    %c0_i32_0 = arith.constant 0 : i32
    return %arg1, %c0_i32 : i32, i32
  }
  func.func @transform_2(%arg0: i32, %arg1: i32) -> (i32, i32) {
    %c0_i32 = arith.constant 0 : i32
    %c0_i32_0 = arith.constant 0 : i32
    %c0_i32_1 = arith.constant 0 : i32
    return %c0_i32, %c0_i32_0 : i32, i32
  }
  func.func @transform_3(%arg0: i32, %arg1: i32) -> (i32, i32) {
    %c0_i32 = arith.constant 0 : i32
    %c0_i32_0 = arith.constant 0 : i32
    return %arg0, %c0_i32 : i32, i32
  }
}

module attributes {stable_mosaic.version = 11 : i64} {
  func.func @_jj_group_sum_kernel(%arg0: i32, %arg1: memref<128x128xf32, #tpu.memory_space<vmem>>, %arg2: memref<128x1xi32, #tpu.memory_space<vmem>>, %arg3: memref<16x128xf32, #tpu.memory_space<vmem>>) attributes {dimension_semantics = [#tpu.dimension_semantics<arbitrary>], iteration_bounds = array<i64: 1>, scalar_prefetch = 0 : i64, scratch_operands = 0 : i64, tpu.core_type = #tpu.core_type<tc>, window_params = [{transform_indices = @transform_0, window_bounds = array<i64: 128, 128>}, {transform_indices = @transform_1, window_bounds = array<i64: 128, 1>}, {pipeline_mode = #tpu.pipeline_mode<synchronous>, transform_indices = @transform_2, window_bounds = array<i64: 16, 128>}]} {
    %c0_i32 = arith.constant 0 : i32
    %0 = arith.cmpi eq, %arg0, %c0_i32 : i32
    %1 = arith.extui %0 : i1 to i32
    %c0_i32_0 = arith.constant 0 : i32
    %2 = arith.cmpi ne, %1, %c0_i32_0 : i32
    scf.if %2 {
      %cst_8 = arith.constant 0.000000e+00 : f32
      %14 = vector.broadcast %cst_8 : f32 to vector<16x128xf32>
      %c0_9 = arith.constant 0 : index
      %c0_10 = arith.constant 0 : index
      %15 = vector.load %arg3[%c0_9, %c0_10] : memref<16x128xf32, #tpu.memory_space<vmem>>, vector<16x128xf32>
      tpu.vector_store %arg3[%c0_9, %c0_10], %14 {strides = array<i32>} : memref<16x128xf32, #tpu.memory_space<vmem>>, vector<16x128xf32>,
    } else {
    }
    %3 = tpu.iota {dimensions = array<i32: 1>} : vector<128x16xi32>
    %c0 = arith.constant 0 : index
    %c0_1 = arith.constant 0 : index
    %4 = vector.load %arg2[%c0, %c0_1] : memref<128x1xi32, #tpu.memory_space<vmem>>, vector<128x1xi32>
    %5 = vector.broadcast %4 : vector<128x1xi32> to vector<128x16xi32>
    %6 = arith.cmpi eq, %5, %3 : vector<128x16xi32>
    %7 = arith.extui %6 : vector<128x16xi1> to vector<128x16xi32>
    %8 = arith.sitofp %7 : vector<128x16xi32> to vector<128x16xf32>
    %c0_2 = arith.constant 0 : index
    %c0_3 = arith.constant 0 : index
    %9 = vector.load %arg3[%c0_2, %c0_3] : memref<16x128xf32, #tpu.memory_space<vmem>>, vector<16x128xf32>
    %c0_4 = arith.constant 0 : index
    %c0_5 = arith.constant 0 : index
    %10 = vector.load %arg1[%c0_4, %c0_5] : memref<128x128xf32, #tpu.memory_space<vmem>>, vector<128x128xf32>
    %cst = arith.constant dense<0.000000e+00> : vector<16x128xf32>
    %11 = tpu.matmul %8, %10, %cst {dimension_numbers = #tpu.dot_dimension_numbers<[0], [0], [1], [1], [0, 1, 1, 1], [], []>} : vector<128x16xf32>, vector<128x128xf32>, vector<16x128xf32> -> vector<16x128xf32>
    %12 = arith.addf %9, %11 : vector<16x128xf32>
    %c0_6 = arith.constant 0 : index
    %c0_7 = arith.constant 0 : index
    %13 = vector.load %arg3[%c0_6, %c0_7] : memref<16x128xf32, #tpu.memory_space<vmem>>, vector<16x128xf32>
    tpu.vector_store %arg3[%c0_6, %c0_7], %12 {strides = array<i32>} : memref<16x128xf32, #tpu.memory_space<vmem>>, vector<16x128xf32>,
    return
  }
  func.func @transform_0(%arg0: i32) -> (i32, i32) {
    %c0_i32 = arith.constant 0 : i32
    %c0_i32_0 = arith.constant 0 : i32
    return %arg0, %c0_i32 : i32, i32
  }
  func.func @transform_1(%arg0: i32) -> (i32, i32) {
    %c0_i32 = arith.constant 0 : i32
    %c0_i32_0 = arith.constant 0 : i32
    return %arg0, %c0_i32 : i32, i32
  }
  func.func @transform_2(%arg0: i32) -> (i32, i32) {
    %c0_i32 = arith.constant 0 : i32
    %c0_i32_0 = arith.constant 0 : i32
    %c0_i32_1 = arith.constant 0 : i32
    return %c0_i32, %c0_i32_0 : i32, i32
  }
}

module attributes {stable_mosaic.version = 11 : i64} {
  func.func @_jj_dev_kernel(%arg0: i32, %arg1: memref<128x128xf32, #tpu.memory_space<vmem>>, %arg2: memref<128x1xi32, #tpu.memory_space<vmem>>, %arg3: memref<128x1xi32, #tpu.memory_space<vmem>>, %arg4: memref<16x128xf32, #tpu.memory_space<vmem>>, %arg5: memref<16x128xf32, #tpu.memory_space<vmem>>, %arg6: memref<8x128xf32, #tpu.memory_space<vmem>>, %arg7: memref<8x128xf32, #tpu.memory_space<vmem>>) attributes {dimension_semantics = [#tpu.dimension_semantics<arbitrary>], iteration_bounds = array<i64: 1>, scalar_prefetch = 0 : i64, scratch_operands = 0 : i64, tpu.core_type = #tpu.core_type<tc>, window_params = [{transform_indices = @transform_0, window_bounds = array<i64: 128, 128>}, {transform_indices = @transform_1, window_bounds = array<i64: 128, 1>}, {transform_indices = @transform_2, window_bounds = array<i64: 128, 1>}, {pipeline_mode = #tpu.pipeline_mode<synchronous>, transform_indices = @transform_3, window_bounds = array<i64: 16, 128>}, {pipeline_mode = #tpu.pipeline_mode<synchronous>, transform_indices = @transform_4, window_bounds = array<i64: 16, 128>}, {pipeline_mode = #tpu.pipeline_mode<synchronous>, transform_indices = @transform_5, window_bounds = array<i64: 8, 128>}, {pipeline_mode = #tpu.pipeline_mode<synchronous>, transform_indices = @transform_6, window_bounds = array<i64: 8, 128>}]} {
    %c0_i32 = arith.constant 0 : i32
    %0 = arith.cmpi eq, %arg0, %c0_i32 : i32
    %1 = arith.extui %0 : i1 to i32
    %c0_i32_0 = arith.constant 0 : i32
    %2 = arith.cmpi ne, %1, %c0_i32_0 : i32
    scf.if %2 {
      %cst_21 = arith.constant 0.000000e+00 : f32
      %32 = vector.broadcast %cst_21 : f32 to vector<8x128xf32>
      %c0_22 = arith.constant 0 : index
      %c0_23 = arith.constant 0 : index
      %33 = vector.load %arg6[%c0_22, %c0_23] : memref<8x128xf32, #tpu.memory_space<vmem>>, vector<8x128xf32>
      tpu.vector_store %arg6[%c0_22, %c0_23], %32 {strides = array<i32>} : memref<8x128xf32, #tpu.memory_space<vmem>>, vector<8x128xf32>,
      %cst_24 = arith.constant 0.000000e+00 : f32
      %34 = vector.broadcast %cst_24 : f32 to vector<8x128xf32>
      %c0_25 = arith.constant 0 : index
      %c0_26 = arith.constant 0 : index
      %35 = vector.load %arg7[%c0_25, %c0_26] : memref<8x128xf32, #tpu.memory_space<vmem>>, vector<8x128xf32>
      tpu.vector_store %arg7[%c0_25, %c0_26], %34 {strides = array<i32>} : memref<8x128xf32, #tpu.memory_space<vmem>>, vector<8x128xf32>,
    } else {
    }
    %3 = tpu.iota {dimensions = array<i32: 1>} : vector<128x16xi32>
    %c0 = arith.constant 0 : index
    %c0_1 = arith.constant 0 : index
    %4 = vector.load %arg2[%c0, %c0_1] : memref<128x1xi32, #tpu.memory_space<vmem>>, vector<128x1xi32>
    %5 = vector.broadcast %4 : vector<128x1xi32> to vector<128x16xi32>
    %6 = arith.cmpi eq, %5, %3 : vector<128x16xi32>
    %7 = arith.extui %6 : vector<128x16xi1> to vector<128x16xi32>
    %8 = arith.sitofp %7 : vector<128x16xi32> to vector<128x16xf32>
    %c0_2 = arith.constant 0 : index
    %c0_3 = arith.constant 0 : index
    %9 = vector.load %arg4[%c0_2, %c0_3] : memref<16x128xf32, #tpu.memory_space<vmem>>, vector<16x128xf32>
    %cst = arith.constant dense<0.000000e+00> : vector<128x128xf32>
    %10 = tpu.matmul %8, %9, %cst {dimension_numbers = #tpu.dot_dimension_numbers<[1], [0], [0], [1], [0, 0, 1, 1], [], []>} : vector<128x16xf32>, vector<16x128xf32>, vector<128x128xf32> -> vector<128x128xf32>
    %c0_4 = arith.constant 0 : index
    %c0_5 = arith.constant 0 : index
    %11 = vector.load %arg5[%c0_4, %c0_5] : memref<16x128xf32, #tpu.memory_space<vmem>>, vector<16x128xf32>
    %cst_6 = arith.constant dense<0.000000e+00> : vector<128x128xf32>
    %12 = tpu.matmul %8, %11, %cst_6 {dimension_numbers = #tpu.dot_dimension_numbers<[1], [0], [0], [1], [0, 0, 1, 1], [], []>} : vector<128x16xf32>, vector<16x128xf32>, vector<128x128xf32> -> vector<128x128xf32>
    %c0_7 = arith.constant 0 : index
    %c0_8 = arith.constant 0 : index
    %13 = vector.load %arg1[%c0_7, %c0_8] : memref<128x128xf32, #tpu.memory_space<vmem>>, vector<128x128xf32>
    %14 = arith.subf %13, %10 : vector<128x128xf32>
    %15 = arith.mulf %14, %14 : vector<128x128xf32>
    %16 = arith.subf %10, %12 : vector<128x128xf32>
    %17 = arith.mulf %16, %16 : vector<128x128xf32>
    %18 = tpu.iota {dimensions = array<i32: 1>} : vector<128x8xi32>
    %c0_9 = arith.constant 0 : index
    %c0_10 = arith.constant 0 : index
    %19 = vector.load %arg3[%c0_9, %c0_10] : memref<128x1xi32, #tpu.memory_space<vmem>>, vector<128x1xi32>
    %20 = vector.broadcast %19 : vector<128x1xi32> to vector<128x8xi32>
    %21 = arith.cmpi eq, %20, %18 : vector<128x8xi32>
    %22 = arith.extui %21 : vector<128x8xi1> to vector<128x8xi32>
    %23 = arith.sitofp %22 : vector<128x8xi32> to vector<128x8xf32>
    %c0_11 = arith.constant 0 : index
    %c0_12 = arith.constant 0 : index
    %24 = vector.load %arg6[%c0_11, %c0_12] : memref<8x128xf32, #tpu.memory_space<vmem>>, vector<8x128xf32>
    %cst_13 = arith.constant dense<0.000000e+00> : vector<8x128xf32>
    %25 = tpu.matmul %23, %15, %cst_13 {dimension_numbers = #tpu.dot_dimension_numbers<[0], [0], [1], [1], [0, 1, 1, 1], [], []>} : vector<128x8xf32>, vector<128x128xf32>, vector<8x128xf32> -> vector<8x128xf32>
    %26 = arith.addf %24, %25 : vector<8x128xf32>
    %c0_14 = arith.constant 0 : index
    %c0_15 = arith.constant 0 : index
    %27 = vector.load %arg6[%c0_14, %c0_15] : memref<8x128xf32, #tpu.memory_space<vmem>>, vector<8x128xf32>
    tpu.vector_store %arg6[%c0_14, %c0_15], %26 {strides = array<i32>} : memref<8x128xf32, #tpu.memory_space<vmem>>, vector<8x128xf32>,
    %c0_16 = arith.constant 0 : index
    %c0_17 = arith.constant 0 : index
    %28 = vector.load %arg7[%c0_16, %c0_17] : memref<8x128xf32, #tpu.memory_space<vmem>>, vector<8x128xf32>
    %cst_18 = arith.constant dense<0.000000e+00> : vector<8x128xf32>
    %29 = tpu.matmul %23, %17, %cst_18 {dimension_numbers = #tpu.dot_dimension_numbers<[0], [0], [1], [1], [0, 1, 1, 1], [], []>} : vector<128x8xf32>, vector<128x128xf32>, vector<8x128xf32> -> vector<8x128xf32>
    %30 = arith.addf %28, %29 : vector<8x128xf32>
    %c0_19 = arith.constant 0 : index
    %c0_20 = arith.constant 0 : index
    %31 = vector.load %arg7[%c0_19, %c0_20] : memref<8x128xf32, #tpu.memory_space<vmem>>, vector<8x128xf32>
    tpu.vector_store %arg7[%c0_19, %c0_20], %30 {strides = array<i32>} : memref<8x128xf32, #tpu.memory_space<vmem>>, vector<8x128xf32>,
    return
  }
  func.func @transform_0(%arg0: i32) -> (i32, i32) {
    %c0_i32 = arith.constant 0 : i32
    %c0_i32_0 = arith.constant 0 : i32
    return %arg0, %c0_i32 : i32, i32
  }
  func.func @transform_1(%arg0: i32) -> (i32, i32) {
    %c0_i32 = arith.constant 0 : i32
    %c0_i32_0 = arith.constant 0 : i32
    return %arg0, %c0_i32 : i32, i32
  }
  func.func @transform_2(%arg0: i32) -> (i32, i32) {
    %c0_i32 = arith.constant 0 : i32
    %c0_i32_0 = arith.constant 0 : i32
    return %arg0, %c0_i32 : i32, i32
  }
  func.func @transform_3(%arg0: i32) -> (i32, i32) {
    %c0_i32 = arith.constant 0 : i32
    %c0_i32_0 = arith.constant 0 : i32
    %c0_i32_1 = arith.constant 0 : i32
    return %c0_i32, %c0_i32_0 : i32, i32
  }
  func.func @transform_4(%arg0: i32) -> (i32, i32) {
    %c0_i32 = arith.constant 0 : i32
    %c0_i32_0 = arith.constant 0 : i32
    %c0_i32_1 = arith.constant 0 : i32
    return %c0_i32, %c0_i32_0 : i32, i32
  }
  func.func @transform_5(%arg0: i32) -> (i32, i32) {
    %c0_i32 = arith.constant 0 : i32
    %c0_i32_0 = arith.constant 0 : i32
    %c0_i32_1 = arith.constant 0 : i32
    return %c0_i32, %c0_i32_0 : i32, i32
  }
  func.func @transform_6(%arg0: i32) -> (i32, i32) {
    %c0_i32 = arith.constant 0 : i32
    %c0_i32_0 = arith.constant 0 : i32
    %c0_i32_1 = arith.constant 0 : i32
    return %c0_i32, %c0_i32_0 : i32, i32
  }
}

module attributes {stable_mosaic.version = 11 : i64} {
  func.func @_aggregate_kernel(%arg0: i32, %arg1: i32, %arg2: memref<128x128xbf16, #tpu.memory_space<vmem>>, %arg3: memref<128x128xbf16, #tpu.memory_space<vmem>>, %arg4: memref<1x128xf32, #tpu.memory_space<vmem>>, %arg5: memref<128x128xf32, #tpu.memory_space<vmem>>, %arg6: memref<128x128xf32, #tpu.memory_space<vmem>>) attributes {dimension_semantics = [#tpu.dimension_semantics<parallel>, #tpu.dimension_semantics<arbitrary>], iteration_bounds = array<i64: 1, 1>, scalar_prefetch = 0 : i64, scratch_operands = 1 : i64, tpu.core_type = #tpu.core_type<tc>, window_params = [{transform_indices = @transform_0, window_bounds = array<i64: 128, 128>}, {transform_indices = @transform_1, window_bounds = array<i64: 128, 128>}, {pipeline_mode = #tpu.pipeline_mode<synchronous>, transform_indices = @transform_2, window_bounds = array<i64: 1, 128>}, {transform_indices = @transform_3, window_bounds = array<i64: 128, 128>}]} {
    %c0_i32 = arith.constant 0 : i32
    %0 = arith.cmpi eq, %arg1, %c0_i32 : i32
    %1 = arith.extui %0 : i1 to i32
    %c0_i32_0 = arith.constant 0 : i32
    %2 = arith.cmpi ne, %1, %c0_i32_0 : i32
    scf.if %2 {
      %cst_10 = arith.constant 0.000000e+00 : f32
      %12 = vector.broadcast %cst_10 : f32 to vector<128x128xf32>
      %c0_11 = arith.constant 0 : index
      %c0_12 = arith.constant 0 : index
      %13 = vector.load %arg6[%c0_11, %c0_12] : memref<128x128xf32, #tpu.memory_space<vmem>>, vector<128x128xf32>
      tpu.vector_store %arg6[%c0_11, %c0_12], %12 {strides = array<i32>} : memref<128x128xf32, #tpu.memory_space<vmem>>, vector<128x128xf32>,
    } else {
    }
    %c0 = arith.constant 0 : index
    %c0_1 = arith.constant 0 : index
    %3 = vector.load %arg6[%c0, %c0_1] : memref<128x128xf32, #tpu.memory_space<vmem>>, vector<128x128xf32>
    %c0_2 = arith.constant 0 : index
    %c0_3 = arith.constant 0 : index
    %4 = vector.load %arg2[%c0_2, %c0_3] : memref<128x128xbf16, #tpu.memory_space<vmem>>, vector<128x128xbf16>
    %c0_4 = arith.constant 0 : index
    %c0_5 = arith.constant 0 : index
    %5 = vector.load %arg3[%c0_4, %c0_5] : memref<128x128xbf16, #tpu.memory_space<vmem>>, vector<128x128xbf16>
    %cst = arith.constant dense<0.000000e+00> : vector<128x128xf32>
    %6 = tpu.matmul %4, %5, %cst {dimension_numbers = #tpu.dot_dimension_numbers<[1], [0], [0], [1], [0, 0, 1, 1], [], []>} : vector<128x128xbf16>, vector<128x128xbf16>, vector<128x128xf32> -> vector<128x128xf32>
    %7 = arith.addf %3, %6 : vector<128x128xf32>
    %c0_6 = arith.constant 0 : index
    %c0_7 = arith.constant 0 : index
    %8 = vector.load %arg6[%c0_6, %c0_7] : memref<128x128xf32, #tpu.memory_space<vmem>>, vector<128x128xf32>
    tpu.vector_store %arg6[%c0_6, %c0_7], %7 {strides = array<i32>} : memref<128x128xf32, #tpu.memory_space<vmem>>, vector<128x128xf32>,
    %c0_i32_8 = arith.constant 0 : i32
    %9 = arith.cmpi eq, %arg1, %c0_i32_8 : i32
    %10 = arith.extui %9 : i1 to i32
    %c0_i32_9 = arith.constant 0 : i32
    %11 = arith.cmpi ne, %10, %c0_i32_9 : i32
    scf.if %11 {
      %c0_10 = arith.constant 0 : index
      %c0_11 = arith.constant 0 : index
      %12 = vector.load %arg6[%c0_10, %c0_11] : memref<128x128xf32, #tpu.memory_space<vmem>>, vector<128x128xf32>
      %c0_12 = arith.constant 0 : index
      %c0_13 = arith.constant 0 : index
      %13 = vector.load %arg4[%c0_12, %c0_13] : memref<1x128xf32, #tpu.memory_space<vmem>>, vector<1x128xf32>
      %14 = vector.broadcast %13 : vector<1x128xf32> to vector<128x128xf32>
      %15 = arith.addf %12, %14 : vector<128x128xf32>
      %c0_14 = arith.constant 0 : index
      %c0_15 = arith.constant 0 : index
      %16 = vector.load %arg5[%c0_14, %c0_15] : memref<128x128xf32, #tpu.memory_space<vmem>>, vector<128x128xf32>
      tpu.vector_store %arg5[%c0_14, %c0_15], %15 {strides = array<i32>} : memref<128x128xf32, #tpu.memory_space<vmem>>, vector<128x128xf32>,
    } else {
    }
    return
  }
  func.func @transform_0(%arg0: i32, %arg1: i32) -> (i32, i32) {
    %c0_i32 = arith.constant 0 : i32
    return %arg0, %arg1 : i32, i32
  }
  func.func @transform_1(%arg0: i32, %arg1: i32) -> (i32, i32) {
    %c0_i32 = arith.constant 0 : i32
    %c0_i32_0 = arith.constant 0 : i32
    return %arg1, %c0_i32 : i32, i32
  }
  func.func @transform_2(%arg0: i32, %arg1: i32) -> (i32, i32) {
    %c0_i32 = arith.constant 0 : i32
    %c0_i32_0 = arith.constant 0 : i32
    %c0_i32_1 = arith.constant 0 : i32
    return %c0_i32, %c0_i32_0 : i32, i32
  }
  func.func @transform_3(%arg0: i32, %arg1: i32) -> (i32, i32) {
    %c0_i32 = arith.constant 0 : i32
    %c0_i32_0 = arith.constant 0 : i32
    return %arg0, %c0_i32 : i32, i32
  }
}

</mosaic_0001>

<bundles_post_ra>
// kernel: gcn2_forward.8
= control target key start
LH: loop header
LB: loop body
LE: loop exit
PB: predicated region body
PF: predicated region fallthrough
CT: control target
= control target key end

     0   :  { %s583_s1 = inlined_call_operand.vmem [shape: bf16[128,128], index: 1, kind: input, shape index: {}]   ;;  %s584_s0 = inlined_call_operand.vmem [shape: bf16[128,128], index: 0, kind: input, shape index: {}]   ;;  %s585_s2 = inlined_call_operand.vmem [shape: bf16[128,128], index: 2, kind: output, shape index: {}]  }
   0x1   :  { %v480_v0 = vld [vmem:[%s583_s1 + $0x38] sm:$0xff]   ;;  %v481_v1 = vld [vmem:[%s583_s1 + $0x30] sm:$0xff]   ;;  %v482_v2 = vld [vmem:[%s583_s1 + $0x28] sm:$0xff]  }
   0x2   :  { %432 = vmatprep.subr.bf16.mxu0 %v480_v0  ;;  %464 = vmatprep.subr.bf16.mxu1 %v480_v0  ;;  %v483_v3 = vld [vmem:[%s583_s1 + $0x20] sm:$0xff]   ;;  %v484_v6 = vld [vmem:[%s583_s1 + $0x18] sm:$0xff]   ;;  %v485_v7 = vld [vmem:[%s583_s1 + $0x10] sm:$0xff]  }
   0x3   :  { %433 = vmatpush3.bf16.msra.mxu0 %v480_v0  ;;  %472 = vmatpush3.bf16.msra.mxu1 %v480_v0  ;;  %v488_v4 = vld [vmem:[%s584_s0] sm:$0xff]   ;;  %v486_v8 = vld [vmem:[%s583_s1 + $0x8] sm:$0xff]   ;;  %v492_v12 = vld [vmem:[%s584_s0 + $0x10] sm:$0xff]  }
   0x4   :  { %434 = vmatprep.subr.bf16.mxu0 %v481_v1  ;;  %465 = vmatprep.subr.bf16.mxu1 %v481_v1  ;;  %v489_v5 = vld [vmem:[%s584_s0 + $0x20] sm:$0xff]   ;;  %v490_v10 = vld [vmem:[%s584_s0 + $0x8] sm:$0xff]   ;;  %v493_v13 = vld [vmem:[%s584_s0 + $0x30] sm:$0xff]  }
   0x5   :  { %448 = vmatprep.mubr.bf16.mxu0 %v488_v4  ;;  %456 = vmatprep.mubr.bf16.mxu1 %v489_v5  ;;  %v487_v9 = vld [vmem:[%s583_s1] sm:$0xff]   ;;  %v491_v11 = vld [vmem:[%s584_s0 + $0x28] sm:$0xff]   ;;  %v494_v14 = vld [vmem:[%s584_s0 + $0x18] sm:$0xff]  }
   0x6   :  { %v495_v15 = vld [vmem:[%s584_s0 + $0x38] sm:$0xff]  }
   0x7   :  { %435 = vmatpush3.bf16.msra.mxu0 %v481_v1  ;;  %473 = vmatpush3.bf16.msra.mxu1 %v481_v1 }
   0x8   :  { %436 = vmatprep.subr.bf16.mxu0 %v482_v2  ;;  %466 = vmatprep.subr.bf16.mxu1 %v482_v2 }
   0xb   :  { %437 = vmatpush3.bf16.msra.mxu0 %v482_v2  ;;  %474 = vmatpush3.bf16.msra.mxu1 %v482_v2 }
   0xc   :  { %438 = vmatprep.subr.bf16.mxu0 %v483_v3  ;;  %467 = vmatprep.subr.bf16.mxu1 %v483_v3 }
   0xf   :  { %439 = vmatpush3.bf16.msra.mxu0 %v483_v3  ;;  %475 = vmatpush3.bf16.msra.mxu1 %v483_v3 }
  0x10   :  { %440 = vmatprep.subr.bf16.mxu0 %v484_v6  ;;  %468 = vmatprep.subr.bf16.mxu1 %v484_v6 }
  0x13   :  { %441 = vmatpush3.bf16.msra.mxu0 %v484_v6  ;;  %476 = vmatpush3.bf16.msra.mxu1 %v484_v6 }
  0x14   :  { %442 = vmatprep.subr.bf16.mxu0 %v485_v7  ;;  %469 = vmatprep.subr.bf16.mxu1 %v485_v7 }
  0x17   :  { %443 = vmatpush3.bf16.msra.mxu0 %v485_v7  ;;  %477 = vmatpush3.bf16.msra.mxu1 %v485_v7 }
  0x18   :  { %444 = vmatprep.subr.bf16.mxu0 %v486_v8  ;;  %470 = vmatprep.subr.bf16.mxu1 %v486_v8 }
  0x1b   :  { %445 = vmatpush3.bf16.msra.mxu0 %v486_v8  ;;  %478 = vmatpush3.bf16.msra.mxu1 %v486_v8 }
  0x1c   :  { %446 = vmatprep.subr.bf16.mxu0 %v487_v9  ;;  %471 = vmatprep.subr.bf16.mxu1 %v487_v9 }
  0x1f   :  { %447 = vmatpush3.bf16.msra.mxu0 %v487_v9  ;;  %479 = vmatpush3.bf16.msra.mxu1 %v487_v9 }
  0x22   :  { %449 = vmatmul.mubr.bf16.vlgmr.msra.gmra.mxu0 %v490_v10  ;;  %457 = vmatmul.mubr.bf16.vlgmr.msra.gmra.mxu1 %v491_v11 }
  0x23   :  { %452 = vmatprep.mubr.bf16.mxu0 %v492_v12  ;;  %460 = vmatprep.mubr.bf16.mxu1 %v493_v13 }
  0x2a   :  { %453 = vmatmul.mubr.bf16.gmra.mxu0 %v494_v14  ;;  %461 = vmatmul.mubr.bf16.gmra.mxu1 %v495_v15 }
  0xe2   :  { %v450_v16 = vpop.f32.mrf.mxu0  ;;  %v458_v17 = vpop.f32.mrf.mxu1 }
  0xe4   :  { %v174_v18 = vpop.f32.mrf.mxu0  ;;  %v206_v19 = vpop.f32.mrf.mxu1 }
  0xe6   :  { %v451_v20 = vpop.f32.mrf.mxu0  ;;  %v459_v21 = vpop.f32.mrf.mxu1 }
  0xe7   :  { %v377_v22 = vpack.c.bf16 %v451_v20, %v450_v16  ;;  %v397_v23 = vpack.c.bf16 %v459_v21, %v458_v17 }
  0xe8   :  { %v177_v24 = vpop.f32.mrf.mxu0  ;;  %v209_v25 = vpop.f32.mrf.mxu1 }
  0xe9   :  { %409 = vst [vmem:[%s585_s2 + $0x8] sm:$0xff] %v377_v22   ;;  %413 = vst [vmem:[%s585_s2 + $0x28] sm:$0xff] %v397_v23   ;;  %v372_v26 = vpack.c.bf16 %v177_v24, %v174_v18  ;;  %v392_v27 = vpack.c.bf16 %v209_v25, %v206_v19 }
  0xea   :  { %v454_v28 = vpop.f32.mrf.mxu0  ;;  %v462_v29 = vpop.f32.mrf.mxu1 }
  0xeb   :  { %373 = vst [vmem:[%s585_s2] sm:$0xff] %v372_v26   ;;  %412 = vst [vmem:[%s585_s2 + $0x20] sm:$0xff] %v392_v27  }
  0xec   :  { %v190_v30 = vpop.f32.mrf.mxu0  ;;  %v222_v31 = vpop.f32.mrf.mxu1 }
  0xee   :  { %v455_v32 = vpop.f32.mrf.mxu0  ;;  %v463_v33 = vpop.f32.mrf.mxu1 }
  0xef   :  { %v387_v34 = vpack.c.bf16 %v455_v32, %v454_v28  ;;  %v407_v35 = vpack.c.bf16 %v463_v33, %v462_v29 }
  0xf0   :  { %v193_v36 = vpop.f32.mrf.mxu0  ;;  %v225_v37 = vpop.f32.mrf.mxu1 }
  0xf1   :  { %411 = vst [vmem:[%s585_s2 + $0x18] sm:$0xff] %v387_v34   ;;  %415 = vst [vmem:[%s585_s2 + $0x38] sm:$0xff] %v407_v35   ;;  %v382_v38 = vpack.c.bf16 %v193_v36, %v190_v30  ;;  %v402_v39 = vpack.c.bf16 %v225_v37, %v222_v31 }
  0xf3   :  { %410 = vst [vmem:[%s585_s2 + $0x10] sm:$0xff] %v382_v38   ;;  %414 = vst [vmem:[%s585_s2 + $0x30] sm:$0xff] %v402_v39  }

// kernel: gcn2_forward.10
= control target key start
LH: loop header
LB: loop body
LE: loop exit
PB: predicated region body
PF: predicated region fallthrough
CT: control target
= control target key end

     0   :  { %v337_v0 = vmov 0   ;;  %v17_v31 = vlaneseq  ;;  %v338_v36 = vmov 0.0   ;;  %s490_s1 = inlined_call_operand.vmem [shape: s32[128,1], index: 1, kind: input, shape index: {}]   ;;  %s491_s0 = inlined_call_operand.vmem [shape: f32[128,128], index: 0, kind: input, shape index: {}]   ;;  %s492_s2 = inlined_call_operand.vmem [shape: f32[16,128], index: 2, kind: output, shape index: {}]  }
   0x1   :  { %336 = vset.pattern.permute.xlu1 %v337_v0  ;;  %335 = vset.pattern.permute.xlu0 %v337_v0  ;;  %v21_v1 = vld [vmem:[%s490_s1 + $0x10] sm:$0xff]  ;;  %v19_v2 = vld [vmem:[%s490_s1] sm:$0xff]  ;;  %v22_v3 = vld [vmem:[%s490_s1 + $0x18] sm:$0xff] }
   0x2   :  { %42 = vperm.xlu1 %336, %v21_v1   ;;  %36 = vperm.xlu0 %335, %v19_v2   ;;  %v20_v4 = vld [vmem:[%s490_s1 + $0x8] sm:$0xff]  ;;  %v23_v6 = vld [vmem:[%s490_s1 + $0x20] sm:$0xff]  ;;  %v26_v7 = vld [vmem:[%s490_s1 + $0x38] sm:$0xff]  ;;  %v444_v32 = vand.u32 127, %v17_v31 }
   0x3   :  { %v24_v5 = vld [vmem:[%s490_s1 + $0x28] sm:$0xff]  ;;  %v25_v8 = vld [vmem:[%s490_s1 + $0x30] sm:$0xff]  ;;  %v27_v10 = vld [vmem:[%s490_s1 + $0x40] sm:$0xff] }
   0x4   :  { %v28_v9 = vld [vmem:[%s490_s1 + $0x48] sm:$0xff]  ;;  %v30_v11 = vld [vmem:[%s490_s1 + $0x58] sm:$0xff]  ;;  %v29_v12 = vld [vmem:[%s490_s1 + $0x50] sm:$0xff] }
   0x5   :  { %v32_v13 = vld [vmem:[%s490_s1 + $0x68] sm:$0xff]  ;;  %v31_v14 = vld [vmem:[%s490_s1 + $0x60] sm:$0xff]  ;;  %v34_v15 = vld [vmem:[%s490_s1 + $0x78] sm:$0xff] }
   0x6   :  { %45 = vperm.xlu1 %336, %v22_v3   ;;  %39 = vperm.xlu0 %335, %v20_v4   ;;  %v33_v16 = vld [vmem:[%s490_s1 + $0x70] sm:$0xff]  ;;  %v148_v17 = vld [vmem:[%s491_s0 + $0x78] sm:$0xff]  ;;  %v146_v19 = vld [vmem:[%s491_s0 + $0x68] sm:$0xff] }
   0x7   :  { %v147_v18 = vld [vmem:[%s491_s0 + $0x70] sm:$0xff]  ;;  %298 = vmatprep.subr.mxu0 %v148_v17  ;;  %v145_v20 = vld [vmem:[%s491_s0 + $0x60] sm:$0xff]  ;;  %v144_v21 = vld [vmem:[%s491_s0 + $0x58] sm:$0xff] }
   0x8   :  { %299 = vmatpush3.msra.mxu0 %v148_v17  ;;  %v143_v22 = vld [vmem:[%s491_s0 + $0x50] sm:$0xff]  ;;  %v142_v23 = vld [vmem:[%s491_s0 + $0x48] sm:$0xff]  ;;  %v141_v24 = vld [vmem:[%s491_s0 + $0x40] sm:$0xff] }
   0x9   :  { %300 = vmatprep.subr.mxu0 %v147_v18  ;;  %v140_v25 = vld [vmem:[%s491_s0 + $0x38] sm:$0xff]  ;;  %v139_v26 = vld [vmem:[%s491_s0 + $0x30] sm:$0xff]  ;;  %v138_v27 = vld [vmem:[%s491_s0 + $0x28] sm:$0xff] }
   0xa   :  { %51 = vperm.xlu1 %336, %v24_v5   ;;  %48 = vperm.xlu0 %335, %v23_v6   ;;  %v137_v28 = vld [vmem:[%s491_s0 + $0x20] sm:$0xff]  ;;  %v136_v29 = vld [vmem:[%s491_s0 + $0x18] sm:$0xff]  ;;  %v135_v30 = vld [vmem:[%s491_s0 + $0x10] sm:$0xff] }
   0xb   :  { %301 = vmatpush3.msra.mxu0 %v147_v18  ;;  %v134_v33 = vld [vmem:[%s491_s0 + $0x8] sm:$0xff]  ;;  %v133_v35 = vld [vmem:[%s491_s0] sm:$0xff] }
   0xc   :  { %302 = vmatprep.subr.mxu0 %v146_v19 }
   0xd   :  { %303 = vmatpush3.msra.mxu0 %v146_v19 }
   0xe   :  { %57 = vperm.xlu1 %336, %v26_v7   ;;  %54 = vperm.xlu0 %335, %v25_v8  }
   0xf   :  { %304 = vmatprep.subr.mxu0 %v145_v20 }
  0x10   :  { %305 = vmatpush3.msra.mxu0 %v145_v20 }
  0x11   :  { %306 = vmatprep.subr.mxu0 %v144_v21 }
  0x12   :  { %63 = vperm.xlu1 %336, %v28_v9   ;;  %60 = vperm.xlu0 %335, %v27_v10  }
  0x13   :  { %307 = vmatpush3.msra.mxu0 %v144_v21 }
  0x14   :  { %308 = vmatprep.subr.mxu0 %v143_v22 }
  0x15   :  { %309 = vmatpush3.msra.mxu0 %v143_v22 }
  0x16   :  { %69 = vperm.xlu1 %336, %v30_v11   ;;  %66 = vperm.xlu0 %335, %v29_v12  }
  0x17   :  { %310 = vmatprep.subr.mxu0 %v142_v23 }
  0x18   :  { %311 = vmatpush3.msra.mxu0 %v142_v23 }
  0x19   :  { %312 = vmatprep.subr.mxu0 %v141_v24 }
  0x1a   :  { %75 = vperm.xlu1 %336, %v32_v13   ;;  %72 = vperm.xlu0 %335, %v31_v14  }
  0x1b   :  { %313 = vmatpush3.msra.mxu0 %v141_v24 }
  0x1c   :  { %314 = vmatprep.subr.mxu0 %v140_v25 }
  0x1d   :  { %315 = vmatpush3.msra.mxu0 %v140_v25 }
  0x1e   :  { %81 = vperm.xlu1 %336, %v34_v15   ;;  %78 = vperm.xlu0 %335, %v33_v16  }
  0x1f   :  { %316 = vmatprep.subr.mxu0 %v139_v26 }
  0x20   :  { %317 = vmatpush3.msra.mxu0 %v139_v26 }
  0x21   :  { %318 = vmatprep.subr.mxu0 %v138_v27 }
  0x22   :  { %319 = vmatpush3.msra.mxu0 %v138_v27 }
  0x23   :  { %320 = vmatprep.subr.mxu0 %v137_v28 }
  0x24   :  { %321 = vmatpush3.msra.mxu0 %v137_v28 }
  0x25   :  { %322 = vmatprep.subr.mxu0 %v136_v29 }
  0x26   :  { %323 = vmatpush3.msra.mxu0 %v136_v29 }
  0x27   :  { %324 = vmatprep.subr.mxu0 %v135_v30 }
  0x28   :  { %325 = vmatpush3.msra.mxu0 %v135_v30 }
  0x29   :  { %326 = vmatprep.subr.mxu0 %v134_v33 }
  0x2a   :  { %327 = vmatpush3.msra.mxu0 %v134_v33 }
  0x2b   :  { %328 = vmatprep.subr.mxu0 %v133_v35 }
  0x2c   :  { %329 = vmatpush3.msra.mxu0 %v133_v35 }
  0x7d   :  { %v37_v34 = vpop.permute.xlu0 %36  ;;  %v43_v38 = vpop.permute.xlu1 %42 }
  0x7e   :  { %vm83_vm0 = vcmp.eq.s32.totalorder %v37_v34, %v444_v32  ;;  %vm85_vm1 = vcmp.eq.s32.totalorder %v43_v38, %v444_v32 }
  0x7f   :  { %v264_v37 = vsel %vm83_vm0, 1.0, %v338_v36  ;;  %v266_v41 = vsel %vm85_vm1, 1.0, %v338_v36 }
  0x80   :  { %149 = vxpose.xlu0.b32.start [1/16] (narrow) %v264_v37, 16 }
  0x81   :  { %v40_v39 = vpop.permute.xlu0 %39  ;;  %v46_v42 = vpop.permute.xlu1 %45 }
  0x82   :  { %vm84_vm2 = vcmp.eq.s32.totalorder %v40_v39, %v444_v32  ;;  %vm86_vm3 = vcmp.eq.s32.totalorder %v46_v42, %v444_v32 }
  0x83   :  { %v265_v40 = vsel %vm84_vm2, 1.0, %v338_v36  ;;  %v267_v44 = vsel %vm86_vm3, 1.0, %v338_v36 }
  0x84   :  { %150 = vxpose.xlu0.b32.cont [2/16] (narrow) %v265_v40, 16 }
  0x85   :  { %v49_v43 = vpop.permute.xlu0 %48  ;;  %v52_v45 = vpop.permute.xlu1 %51 }
  0x86   :  { %vm87_vm4 = vcmp.eq.s32.totalorder %v49_v43, %v444_v32  ;;  %vm88_vm5 = vcmp.eq.s32.totalorder %v52_v45, %v444_v32 }
  0x87   :  { %v268_v46 = vsel %vm87_vm4, 1.0, %v338_v36  ;;  %v269_v48 = vsel %vm88_vm5, 1.0, %v338_v36 }
  0x88   :  { %151 = vxpose.xlu0.b32.cont [3/16] (narrow) %v266_v41, 16 }
  0x89   :  { %v55_v47 = vpop.permute.xlu0 %54  ;;  %v58_v49 = vpop.permute.xlu1 %57 }
  0x8a   :  { %vm89_vm6 = vcmp.eq.s32.totalorder %v55_v47, %v444_v32  ;;  %vm90_vm7 = vcmp.eq.s32.totalorder %v58_v49, %v444_v32 }
  0x8b   :  { %v270_v50 = vsel %vm89_vm6, 1.0, %v338_v36  ;;  %v271_v52 = vsel %vm90_vm7, 1.0, %v338_v36 }
  0x8c   :  { %152 = vxpose.xlu0.b32.cont [4/16] (narrow) %v267_v44, 16 }
  0x8d   :  { %v61_v51 = vpop.permute.xlu0 %60  ;;  %v64_v53 = vpop.permute.xlu1 %63 }
  0x8e   :  { %vm91_vm8 = vcmp.eq.s32.totalorder %v61_v51, %v444_v32  ;;  %vm92_vm9 = vcmp.eq.s32.totalorder %v64_v53, %v444_v32 }
  0x8f   :  { %v272_v54 = vsel %vm91_vm8, 1.0, %v338_v36  ;;  %v273_v56 = vsel %vm92_vm9, 1.0, %v338_v36 }
  0x90   :  { %153 = vxpose.xlu0.b32.cont [5/16] (narrow) %v268_v46, 16 }
  0x91   :  { %v67_v55 = vpop.permute.xlu0 %66  ;;  %v70_v57 = vpop.permute.xlu1 %69 }
  0x92   :  { %vm93_vm10 = vcmp.eq.s32.totalorder %v67_v55, %v444_v32  ;;  %vm94_vm11 = vcmp.eq.s32.totalorder %v70_v57, %v444_v32 }
  0x93   :  { %v274_v58 = vsel %vm93_vm10, 1.0, %v338_v36  ;;  %v275_v60 = vsel %vm94_vm11, 1.0, %v338_v36 }
  0x94   :  { %154 = vxpose.xlu0.b32.cont [6/16] (narrow) %v269_v48, 16 }
  0x95   :  { %v73_v59 = vpop.permute.xlu0 %72  ;;  %v76_v61 = vpop.permute.xlu1 %75 }
  0x96   :  { %vm95_vm12 = vcmp.eq.s32.totalorder %v73_v59, %v444_v32  ;;  %vm96_vm13 = vcmp.eq.s32.totalorder %v76_v61, %v444_v32 }
  0x97   :  { %v276_v62 = vsel %vm95_vm12, 1.0, %v338_v36  ;;  %v277_v0 = vsel %vm96_vm13, 1.0, %v338_v36 }
  0x98   :  { %155 = vxpose.xlu0.b32.cont [7/16] (narrow) %v270_v50, 16 }
  0x99   :  { %v79_v63 = vpop.permute.xlu0 %78  ;;  %v82_v1 = vpop.permute.xlu1 %81 }
  0x9a   :  { %vm97_vm14 = vcmp.eq.s32.totalorder %v79_v63, %v444_v32  ;;  %vm98_vm15 = vcmp.eq.s32.totalorder %v82_v1, %v444_v32 }
  0x9b   :  { %v278_v2 = vsel %vm97_vm14, 1.0, %v338_v36  ;;  %v279_v3 = vsel %vm98_vm15, 1.0, %v338_v36 }
  0x9c   :  { %156 = vxpose.xlu0.b32.cont [8/16] (narrow) %v271_v52, 16 }
  0xa0   :  { %157 = vxpose.xlu0.b32.cont [9/16] (narrow) %v272_v54, 16 }
  0xa4   :  { %158 = vxpose.xlu0.b32.cont [10/16] (narrow) %v273_v56, 16 }
  0xa8   :  { %159 = vxpose.xlu0.b32.cont [11/16] (narrow) %v274_v58, 16 }
  0xac   :  { %160 = vxpose.xlu0.b32.cont [12/16] (narrow) %v275_v60, 16 }
  0xb0   :  { %161 = vxpose.xlu0.b32.cont [13/16] (narrow) %v276_v62, 16 }
  0xb4   :  { %162 = vxpose.xlu0.b32.cont [14/16] (narrow) %v277_v0, 16 }
  0xb8   :  { %163 = vxpose.xlu0.b32.cont [15/16] (narrow) %v278_v2, 16 }
  0xbc   :  { %164 = vxpose.xlu0.b32.end [16/16] (narrow) %v279_v3, 16 }
  0xfc   :  { %v165_v4 = vpop.trf.xlu0 }
  0xfd   :  { %330 = vmatprep.mubr.f32.mxu0 %v165_v4 }
 0x100   :  { %v166_v5 = vpop.trf.xlu0 }
 0x101   :  { %331 = vmatmul.mubr.f32.vlgmr.msra.gmra.mxu0 %v166_v5 }
 0x1c1   :  { %v332_v6 = vpop.f32.mrf.mxu0 }
 0x1c2   :  { %259 = vst [vmem:[%s492_s2 + $0x8] sm:$0xff] %v332_v6 }
 0x1c3   :  { %v247_v7 = vpop.f32.mrf.mxu0 }
 0x1c4   :  { %258 = vst [vmem:[%s492_s2] sm:$0xff] %v247_v7 }

// kernel: gcn2_forward.9
= control target key start
LH: loop header
LB: loop body
LE: loop exit
PB: predicated region body
PF: predicated region fallthrough
CT: control target
= control target key end

     0   :  { %s602_s1 = inlined_call_operand.vmem [shape: bf16[128,128], index: 1, kind: input, shape index: {}]   ;;  %s603_s0 = inlined_call_operand.vmem [shape: bf16[128,128], index: 0, kind: input, shape index: {}]   ;;  %s604_s2 = inlined_call_operand.vmem [shape: f32[1,128], index: 2, kind: input, shape index: {}]   ;;  %s605_s3 = inlined_call_operand.vmem [shape: f32[128,128], index: 3, kind: output, shape index: {}]  }
   0x1   :  { %v467_v0 = vld [vmem:[%s602_s1 + $0x38] sm:$0xff]   ;;  %v468_v1 = vld [vmem:[%s602_s1 + $0x30] sm:$0xff]   ;;  %v469_v2 = vld [vmem:[%s602_s1 + $0x28] sm:$0xff]  }
   0x2   :  { %419 = vmatprep.subr.bf16.mxu0 %v467_v0  ;;  %451 = vmatprep.subr.bf16.mxu1 %v467_v0  ;;  %v470_v3 = vld [vmem:[%s602_s1 + $0x20] sm:$0xff]   ;;  %v471_v6 = vld [vmem:[%s602_s1 + $0x18] sm:$0xff]   ;;  %v472_v7 = vld [vmem:[%s602_s1 + $0x10] sm:$0xff]  }
   0x3   :  { %420 = vmatpush3.bf16.msra.mxu0 %v467_v0  ;;  %459 = vmatpush3.bf16.msra.mxu1 %v467_v0  ;;  %v475_v4 = vld [vmem:[%s603_s0] sm:$0xff]   ;;  %v473_v8 = vld [vmem:[%s602_s1 + $0x8] sm:$0xff]   ;;  %v479_v12 = vld [vmem:[%s603_s0 + $0x10] sm:$0xff]  }
   0x4   :  { %421 = vmatprep.subr.bf16.mxu0 %v468_v1  ;;  %452 = vmatprep.subr.bf16.mxu1 %v468_v1  ;;  %v476_v5 = vld [vmem:[%s603_s0 + $0x20] sm:$0xff]   ;;  %v477_v10 = vld [vmem:[%s603_s0 + $0x8] sm:$0xff]   ;;  %v480_v13 = vld [vmem:[%s603_s0 + $0x30] sm:$0xff]  }
   0x5   :  { %435 = vmatprep.mubr.bf16.mxu0 %v475_v4  ;;  %443 = vmatprep.mubr.bf16.mxu1 %v476_v5  ;;  %v474_v9 = vld [vmem:[%s602_s1] sm:$0xff]   ;;  %v478_v11 = vld [vmem:[%s603_s0 + $0x28] sm:$0xff]   ;;  %v481_v14 = vld [vmem:[%s603_s0 + $0x18] sm:$0xff]  }
   0x6   :  { %v482_v15 = vld [vmem:[%s603_s0 + $0x38] sm:$0xff]   ;;  %v402_v16 = vld [vmem:[%s604_s2] ss:$0 sm:$0xff] }
   0x7   :  { %422 = vmatpush3.bf16.msra.mxu0 %v468_v1  ;;  %460 = vmatpush3.bf16.msra.mxu1 %v468_v1 }
   0x8   :  { %423 = vmatprep.subr.bf16.mxu0 %v469_v2  ;;  %453 = vmatprep.subr.bf16.mxu1 %v469_v2 }
   0xb   :  { %424 = vmatpush3.bf16.msra.mxu0 %v469_v2  ;;  %461 = vmatpush3.bf16.msra.mxu1 %v469_v2 }
   0xc   :  { %425 = vmatprep.subr.bf16.mxu0 %v470_v3  ;;  %454 = vmatprep.subr.bf16.mxu1 %v470_v3 }
   0xf   :  { %426 = vmatpush3.bf16.msra.mxu0 %v470_v3  ;;  %462 = vmatpush3.bf16.msra.mxu1 %v470_v3 }
  0x10   :  { %427 = vmatprep.subr.bf16.mxu0 %v471_v6  ;;  %455 = vmatprep.subr.bf16.mxu1 %v471_v6 }
  0x13   :  { %428 = vmatpush3.bf16.msra.mxu0 %v471_v6  ;;  %463 = vmatpush3.bf16.msra.mxu1 %v471_v6 }
  0x14   :  { %429 = vmatprep.subr.bf16.mxu0 %v472_v7  ;;  %456 = vmatprep.subr.bf16.mxu1 %v472_v7 }
  0x17   :  { %430 = vmatpush3.bf16.msra.mxu0 %v472_v7  ;;  %464 = vmatpush3.bf16.msra.mxu1 %v472_v7 }
  0x18   :  { %431 = vmatprep.subr.bf16.mxu0 %v473_v8  ;;  %457 = vmatprep.subr.bf16.mxu1 %v473_v8 }
  0x1b   :  { %432 = vmatpush3.bf16.msra.mxu0 %v473_v8  ;;  %465 = vmatpush3.bf16.msra.mxu1 %v473_v8 }
  0x1c   :  { %433 = vmatprep.subr.bf16.mxu0 %v474_v9  ;;  %458 = vmatprep.subr.bf16.mxu1 %v474_v9 }
  0x1f   :  { %434 = vmatpush3.bf16.msra.mxu0 %v474_v9  ;;  %466 = vmatpush3.bf16.msra.mxu1 %v474_v9 }
  0x22   :  { %436 = vmatmul.mubr.bf16.vlgmr.msra.gmra.mxu0 %v477_v10  ;;  %444 = vmatmul.mubr.bf16.vlgmr.msra.gmra.mxu1 %v478_v11 }
  0x23   :  { %439 = vmatprep.mubr.bf16.mxu0 %v479_v12  ;;  %447 = vmatprep.mubr.bf16.mxu1 %v480_v13 }
  0x2a   :  { %440 = vmatmul.mubr.bf16.gmra.mxu0 %v481_v14  ;;  %448 = vmatmul.mubr.bf16.gmra.mxu1 %v482_v15 }
  0xe2   :  { %v437_v17 = vpop.f32.mrf.mxu0  ;;  %v445_v18 = vpop.f32.mrf.mxu1 }
  0xe3   :  { %v336_v19 = vadd.f32 %v437_v17, %v402_v16  ;;  %v344_v20 = vadd.f32 %v445_v18, %v402_v16 }
  0xe4   :  { %v213_v21 = vpop.f32.mrf.mxu0  ;;  %v245_v22 = vpop.f32.mrf.mxu1 }
  0xe5   :  { %v352_v23 = vmax.f32 %v336_v19, 0.0  ;;  %v360_v24 = vmax.f32 %v344_v20, 0.0  ;;  %v334_v25 = vadd.f32 %v402_v16, %v213_v21  ;;  %v342_v26 = vadd.f32 %v402_v16, %v245_v22 }
  0xe6   :  { %v438_v27 = vpop.f32.mrf.mxu0  ;;  %v446_v28 = vpop.f32.mrf.mxu1 }
  0xe7   :  { %368 = vst [vmem:[%s605_s3 + $0x10] sm:$0xff] %v352_v23  ;;  %376 = vst [vmem:[%s605_s3 + $0x50] sm:$0xff] %v360_v24  ;;  %v350_v29 = vmax.f32 %v334_v25, 0.0  ;;  %v358_v30 = vmax.f32 %v342_v26, 0.0  ;;  %v337_v31 = vadd.f32 %v438_v27, %v402_v16  ;;  %v345_v32 = vadd.f32 %v446_v28, %v402_v16 }
  0xe8   :  { %v216_v33 = vpop.f32.mrf.mxu0  ;;  %v248_v34 = vpop.f32.mrf.mxu1 }
  0xe9   :  { %366 = vst [vmem:[%s605_s3] sm:$0xff] %v350_v29  ;;  %374 = vst [vmem:[%s605_s3 + $0x40] sm:$0xff] %v358_v30  ;;  %v353_v35 = vmax.f32 %v337_v31, 0.0  ;;  %v361_v36 = vmax.f32 %v345_v32, 0.0  ;;  %v335_v37 = vadd.f32 %v402_v16, %v216_v33  ;;  %v343_v38 = vadd.f32 %v402_v16, %v248_v34 }
  0xea   :  { %v441_v39 = vpop.f32.mrf.mxu0  ;;  %v449_v40 = vpop.f32.mrf.mxu1 }
  0xeb   :  { %369 = vst [vmem:[%s605_s3 + $0x18] sm:$0xff] %v353_v35  ;;  %377 = vst [vmem:[%s605_s3 + $0x58] sm:$0xff] %v361_v36  ;;  %v351_v41 = vmax.f32 %v335_v37, 0.0  ;;  %v359_v42 = vmax.f32 %v343_v38, 0.0  ;;  %v340_v43 = vadd.f32 %v441_v39, %v402_v16  ;;  %v348_v44 = vadd.f32 %v449_v40, %v402_v16 }
  0xec   :  { %v229_v45 = vpop.f32.mrf.mxu0  ;;  %v261_v46 = vpop.f32.mrf.mxu1 }
  0xed   :  { %367 = vst [vmem:[%s605_s3 + $0x8] sm:$0xff] %v351_v41  ;;  %375 = vst [vmem:[%s605_s3 + $0x48] sm:$0xff] %v359_v42  ;;  %v356_v47 = vmax.f32 %v340_v43, 0.0  ;;  %v364_v48 = vmax.f32 %v348_v44, 0.0  ;;  %v338_v49 = vadd.f32 %v402_v16, %v229_v45  ;;  %v346_v50 = vadd.f32 %v402_v16, %v261_v46 }
  0xee   :  { %v442_v51 = vpop.f32.mrf.mxu0  ;;  %v450_v52 = vpop.f32.mrf.mxu1 }
  0xef   :  { %372 = vst [vmem:[%s605_s3 + $0x30] sm:$0xff] %v356_v47  ;;  %380 = vst [vmem:[%s605_s3 + $0x70] sm:$0xff] %v364_v48  ;;  %v354_v53 = vmax.f32 %v338_v49, 0.0  ;;  %v362_v54 = vmax.f32 %v346_v50, 0.0  ;;  %v341_v55 = vadd.f32 %v442_v51, %v402_v16  ;;  %v349_v56 = vadd.f32 %v450_v52, %v402_v16 }
  0xf0   :  { %v232_v57 = vpop.f32.mrf.mxu0  ;;  %v264_v58 = vpop.f32.mrf.mxu1 }
  0xf1   :  { %370 = vst [vmem:[%s605_s3 + $0x20] sm:$0xff] %v354_v53  ;;  %378 = vst [vmem:[%s605_s3 + $0x60] sm:$0xff] %v362_v54  ;;  %v357_v59 = vmax.f32 %v341_v55, 0.0  ;;  %v365_v60 = vmax.f32 %v349_v56, 0.0  ;;  %v339_v61 = vadd.f32 %v402_v16, %v232_v57  ;;  %v347_v62 = vadd.f32 %v402_v16, %v264_v58 }
  0xf3   :  { %373 = vst [vmem:[%s605_s3 + $0x38] sm:$0xff] %v357_v59  ;;  %381 = vst [vmem:[%s605_s3 + $0x78] sm:$0xff] %v365_v60  ;;  %v355_v63 = vmax.f32 %v339_v61, 0.0  ;;  %v363_v0 = vmax.f32 %v347_v62, 0.0 }
  0xf5   :  { %371 = vst [vmem:[%s605_s3 + $0x28] sm:$0xff] %v355_v63  ;;  %379 = vst [vmem:[%s605_s3 + $0x68] sm:$0xff] %v363_v0 }

// kernel: gcn2_forward.11
= control target key start
LH: loop header
LB: loop body
LE: loop exit
PB: predicated region body
PF: predicated region fallthrough
CT: control target
= control target key end

     0   :  { %v1128_v0 = vmov 0   ;;  %v1129_v15 = vmov 0.0   ;;  %v28_v38 = vlaneseq  ;;  %vm144_vm0 = vcmask 130048   ;;  %s1523_s1 = inlined_call_operand.vmem [shape: s32[128,1], index: 1, kind: input, shape index: {}]   ;;  %s1524_s3 = inlined_call_operand.vmem [shape: f32[16,128], index: 3, kind: input, shape index: {}]   ;;  %s1525_s4 = inlined_call_operand.vmem [shape: f32[16,128], index: 4, kind: input, shape index: {}]   ;;  %s1526_s2 = inlined_call_operand.vmem [shape: s32[128,1], index: 2, kind: input, shape index: {}]   ;;  %s1527_s0 = inlined_call_operand.vmem [shape: f32[128,128], index: 0, kind: input, shape index: {}]   ;;  %s1528_s5 = inlined_call_operand.vmem [shape: f32[8,128], index: 5, kind: output, shape index: {0}]   ;;  %s1529_s6 = inlined_call_operand.vmem [shape: f32[8,128], index: 6, kind: output, shape index: {1}]  }
   0x1   :  { %1127 = vset.pattern.permute.xlu1 %v1128_v0  ;;  %1126 = vset.pattern.permute.xlu0 %v1128_v0  ;;  %v32_v1 = vld [vmem:[%s1523_s1 + $0x10] sm:$0xff]  ;;  %v30_v2 = vld [vmem:[%s1523_s1] sm:$0xff]  ;;  %v33_v3 = vld [vmem:[%s1523_s1 + $0x18] sm:$0xff] }
   0x2   :  { %53 = vperm.xlu1 %1127, %v32_v1   ;;  %47 = vperm.xlu0 %1126, %v30_v2   ;;  %v31_v4 = vld [vmem:[%s1523_s1 + $0x8] sm:$0xff]  ;;  %v34_v6 = vld [vmem:[%s1523_s1 + $0x20] sm:$0xff]  ;;  %v37_v7 = vld [vmem:[%s1523_s1 + $0x38] sm:$0xff]  ;;  %v1276_v39 = vand.u32 127, %v28_v38 }
   0x3   :  { %v35_v5 = vld [vmem:[%s1523_s1 + $0x28] sm:$0xff]  ;;  %v36_v8 = vld [vmem:[%s1523_s1 + $0x30] sm:$0xff]  ;;  %v142_v11 = vld [vmem:[%s1524_s3] sm:$0xff] }
   0x4   :  { %v143_v9 = vld [vmem:[%s1524_s3 + $0x8] sm:$0xff]  ;;  %v338_v12 = vld [vmem:[%s1525_s4] sm:$0xff]  ;;  %v41_v16 = vld [vmem:[%s1523_s1 + $0x58] sm:$0xff] }
   0x5   :  { %997 = vmatprep.subr.mxu0 %v143_v9  ;;  %v339_v10 = vld [vmem:[%s1525_s4 + $0x8] sm:$0xff]  ;;  %v38_v14 = vld [vmem:[%s1523_s1 + $0x40] sm:$0xff]  ;;  %v40_v17 = vld [vmem:[%s1523_s1 + $0x50] sm:$0xff] }
   0x6   :  { %56 = vperm.xlu1 %1127, %v33_v3   ;;  %50 = vperm.xlu0 %1126, %v31_v4   ;;  %v39_v13 = vld [vmem:[%s1523_s1 + $0x48] sm:$0xff]  ;;  %v42_v19 = vld [vmem:[%s1523_s1 + $0x60] sm:$0xff]  ;;  %v45_v20 = vld [vmem:[%s1523_s1 + $0x78] sm:$0xff] }
   0x7   :  { %1025 = vmatprep.subr.mxu1 %v339_v10  ;;  %998 = vmatpush3.msra.mxu0 %v143_v9  ;;  %v43_v18 = vld [vmem:[%s1523_s1 + $0x68] sm:$0xff]  ;;  %v44_v21 = vld [vmem:[%s1523_s1 + $0x70] sm:$0xff]  ;;  %v565_v23 = vld [vmem:[%s1526_s2] sm:$0xff] }
   0x8   :  { %1026 = vmatpush3.msra.mxu1 %v339_v10  ;;  %999 = vmatprep.subr.mxu0 %v142_v11  ;;  %v566_v22 = vld [vmem:[%s1526_s2 + $0x8] sm:$0xff]  ;;  %v568_v24 = vld [vmem:[%s1526_s2 + $0x18] sm:$0xff]  ;;  %v567_v25 = vld [vmem:[%s1526_s2 + $0x10] sm:$0xff] }
   0x9   :  { %1027 = vmatprep.subr.mxu1 %v338_v12  ;;  %1000 = vmatpush3.msra.mxu0 %v142_v11  ;;  %v570_v26 = vld [vmem:[%s1526_s2 + $0x28] sm:$0xff]  ;;  %v569_v27 = vld [vmem:[%s1526_s2 + $0x20] sm:$0xff]  ;;  %v572_v28 = vld [vmem:[%s1526_s2 + $0x38] sm:$0xff] }
   0xa   :  { %62 = vperm.xlu1 %1127, %v35_v5   ;;  %59 = vperm.xlu0 %1126, %v34_v6   ;;  %v571_v29 = vld [vmem:[%s1526_s2 + $0x30] sm:$0xff]  ;;  %v574_v30 = vld [vmem:[%s1526_s2 + $0x48] sm:$0xff]  ;;  %v573_v31 = vld [vmem:[%s1526_s2 + $0x40] sm:$0xff] }
   0xb   :  { %1028 = vmatpush3.msra.mxu1 %v338_v12  ;;  %1053 = vmatprep.subr.mxu0 %v1129_v15  ;;  %v576_v32 = vld [vmem:[%s1526_s2 + $0x58] sm:$0xff]  ;;  %v575_v33 = vld [vmem:[%s1526_s2 + $0x50] sm:$0xff]  ;;  %v578_v34 = vld [vmem:[%s1526_s2 + $0x68] sm:$0xff] }
   0xc   :  { %1088 = vmatprep.subr.mxu1 %v1129_v15  ;;  %v577_v35 = vld [vmem:[%s1526_s2 + $0x60] sm:$0xff]  ;;  %v580_v36 = vld [vmem:[%s1526_s2 + $0x78] sm:$0xff]  ;;  %v579_v37 = vld [vmem:[%s1526_s2 + $0x70] sm:$0xff] }
   0xe   :  { %68 = vperm.xlu1 %1127, %v37_v7   ;;  %65 = vperm.xlu0 %1126, %v36_v8  }
  0x12   :  { %74 = vperm.xlu1 %1127, %v39_v13   ;;  %71 = vperm.xlu0 %1126, %v38_v14  }
  0x16   :  { %80 = vperm.xlu1 %1127, %v41_v16   ;;  %77 = vperm.xlu0 %1126, %v40_v17  }
  0x1a   :  { %86 = vperm.xlu1 %1127, %v43_v18   ;;  %83 = vperm.xlu0 %1126, %v42_v19  }
  0x1e   :  { %92 = vperm.xlu1 %1127, %v45_v20   ;;  %89 = vperm.xlu0 %1126, %v44_v21  }
  0x22   :  { %585 = vperm.xlu1 %1127, %v566_v22   ;;  %582 = vperm.xlu0 %1126, %v565_v23  }
  0x26   :  { %591 = vperm.xlu1 %1127, %v568_v24   ;;  %588 = vperm.xlu0 %1126, %v567_v25  }
  0x2a   :  { %597 = vperm.xlu1 %1127, %v570_v26   ;;  %594 = vperm.xlu0 %1126, %v569_v27  }
  0x2e   :  { %603 = vperm.xlu1 %1127, %v572_v28   ;;  %600 = vperm.xlu0 %1126, %v571_v29  }
  0x32   :  { %609 = vperm.xlu1 %1127, %v574_v30   ;;  %606 = vperm.xlu0 %1126, %v573_v31  }
  0x36   :  { %615 = vperm.xlu1 %1127, %v576_v32   ;;  %612 = vperm.xlu0 %1126, %v575_v33  }
  0x3a   :  { %621 = vperm.xlu1 %1127, %v578_v34   ;;  %618 = vperm.xlu0 %1126, %v577_v35  }
  0x3e   :  { %627 = vperm.xlu1 %1127, %v580_v36   ;;  %624 = vperm.xlu0 %1126, %v579_v37  }
  0x7d   :  { %v54_v40 = vpop.permute.xlu1 %53  ;;  %v48_v41 = vpop.permute.xlu0 %47 }
  0x7e   :  { %vm94_vm1 = vcmp.eq.s32.totalorder %v48_v41, %v1276_v39  ;;  %vm96_vm2 = vcmp.eq.s32.totalorder %v54_v40, %v1276_v39 }
  0x7f   :  { %v863_v42 = vsel %vm94_vm1, 1.0, %v1129_v15  ;;  %v865_v45 = vsel %vm96_vm2, 1.0, %v1129_v15 }
  0x80   :  { %1001 = vmatprep.mubr.msk.f32.mxu0 %vm144_vm0, %v863_v42  ;;  %1029 = vmatprep.mubr.msk.f32.mxu1 %vm144_vm0, %v863_v42 }
  0x81   :  { %v57_v43 = vpop.permute.xlu1 %56  ;;  %v51_v44 = vpop.permute.xlu0 %50 }
  0x82   :  { %vm95_vm3 = vcmp.eq.s32.totalorder %v51_v44, %v1276_v39  ;;  %vm97_vm4 = vcmp.eq.s32.totalorder %v57_v43, %v1276_v39 }
  0x83   :  { %v864_v46 = vsel %vm95_vm3, 1.0, %v1129_v15  ;;  %v866_v49 = vsel %vm97_vm4, 1.0, %v1129_v15 }
  0x84   :  { %1002 = vmatmul.mubr.msk.f32.vlgmr.msra.gmra.mxu0 %vm144_vm0, %v864_v46  ;;  %1030 = vmatmul.mubr.msk.f32.vlgmr.msra.gmra.mxu1 %vm144_vm0, %v864_v46 }
  0x85   :  { %v63_v47 = vpop.permute.xlu1 %62  ;;  %1004 = vmatprep.mubr.msk.f32.mxu0 %vm144_vm0, %v865_v45  ;;  %1032 = vmatprep.mubr.msk.f32.mxu1 %vm144_vm0, %v865_v45  ;;  %v60_v48 = vpop.permute.xlu0 %59 }
  0x86   :  { %vm98_vm5 = vcmp.eq.s32.totalorder %v60_v48, %v1276_v39  ;;  %vm99_vm6 = vcmp.eq.s32.totalorder %v63_v47, %v1276_v39 }
  0x87   :  { %v867_v50 = vsel %vm98_vm5, 1.0, %v1129_v15  ;;  %v868_v53 = vsel %vm99_vm6, 1.0, %v1129_v15 }
  0x88   :  { %1005 = vmatmul.mubr.msk.f32.gmra.mxu0 %vm144_vm0, %v866_v49  ;;  %1033 = vmatmul.mubr.msk.f32.gmra.mxu1 %vm144_vm0, %v866_v49 }
  0x89   :  { %v69_v51 = vpop.permute.xlu1 %68  ;;  %1007 = vmatprep.mubr.msk.f32.mxu0 %vm144_vm0, %v867_v50  ;;  %1035 = vmatprep.mubr.msk.f32.mxu1 %vm144_vm0, %v867_v50  ;;  %v66_v52 = vpop.permute.xlu0 %65 }
  0x8a   :  { %vm100_vm7 = vcmp.eq.s32.totalorder %v66_v52, %v1276_v39  ;;  %vm101_vm8 = vcmp.eq.s32.totalorder %v69_v51, %v1276_v39 }
  0x8b   :  { %v869_v54 = vsel %vm100_vm7, 1.0, %v1129_v15  ;;  %v870_v57 = vsel %vm101_vm8, 1.0, %v1129_v15 }
  0x8c   :  { %1008 = vmatmul.mubr.msk.f32.gmra.mxu0 %vm144_vm0, %v868_v53  ;;  %1036 = vmatmul.mubr.msk.f32.gmra.mxu1 %vm144_vm0, %v868_v53 }
  0x8d   :  { %v75_v55 = vpop.permute.xlu1 %74  ;;  %1010 = vmatprep.mubr.msk.f32.mxu0 %vm144_vm0, %v869_v54  ;;  %1038 = vmatprep.mubr.msk.f32.mxu1 %vm144_vm0, %v869_v54  ;;  %v72_v56 = vpop.permute.xlu0 %71 }
  0x8e   :  { %vm102_vm9 = vcmp.eq.s32.totalorder %v72_v56, %v1276_v39  ;;  %vm103_vm10 = vcmp.eq.s32.totalorder %v75_v55, %v1276_v39 }
  0x8f   :  { %v871_v58 = vsel %vm102_vm9, 1.0, %v1129_v15  ;;  %v872_v61 = vsel %vm103_vm10, 1.0, %v1129_v15 }
  0x90   :  { %1011 = vmatmul.mubr.msk.f32.gmra.mxu0 %vm144_vm0, %v870_v57  ;;  %1039 = vmatmul.mubr.msk.f32.gmra.mxu1 %vm144_vm0, %v870_v57 }
  0x91   :  { %v81_v59 = vpop.permute.xlu1 %80  ;;  %1013 = vmatprep.mubr.msk.f32.mxu0 %vm144_vm0, %v871_v58  ;;  %1041 = vmatprep.mubr.msk.f32.mxu1 %vm144_vm0, %v871_v58  ;;  %v78_v60 = vpop.permute.xlu0 %77 }
  0x92   :  { %vm104_vm11 = vcmp.eq.s32.totalorder %v78_v60, %v1276_v39  ;;  %vm105_vm12 = vcmp.eq.s32.totalorder %v81_v59, %v1276_v39 }
  0x93   :  { %v873_v62 = vsel %vm104_vm11, 1.0, %v1129_v15  ;;  %v874_v1 = vsel %vm105_vm12, 1.0, %v1129_v15 }
  0x94   :  { %1014 = vmatmul.mubr.msk.f32.gmra.mxu0 %vm144_vm0, %v872_v61  ;;  %1042 = vmatmul.mubr.msk.f32.gmra.mxu1 %vm144_vm0, %v872_v61 }
  0x95   :  { %v87_v63 = vpop.permute.xlu1 %86  ;;  %1016 = vmatprep.mubr.msk.f32.mxu0 %vm144_vm0, %v873_v62  ;;  %1044 = vmatprep.mubr.msk.f32.mxu1 %vm144_vm0, %v873_v62  ;;  %v84_v0 = vpop.permute.xlu0 %83 }
  0x96   :  { %vm106_vm13 = vcmp.eq.s32.totalorder %v84_v0, %v1276_v39  ;;  %vm107_vm14 = vcmp.eq.s32.totalorder %v87_v63, %v1276_v39 }
  0x97   :  { %v875_v2 = vsel %vm106_vm13, 1.0, %v1129_v15  ;;  %v876_v5 = vsel %vm107_vm14, 1.0, %v1129_v15 }
  0x98   :  { %1017 = vmatmul.mubr.msk.f32.gmra.mxu0 %vm144_vm0, %v874_v1  ;;  %1045 = vmatmul.mubr.msk.f32.gmra.mxu1 %vm144_vm0, %v874_v1 }
  0x99   :  { %v93_v3 = vpop.permute.xlu1 %92  ;;  %1019 = vmatprep.mubr.msk.f32.mxu0 %vm144_vm0, %v875_v2  ;;  %1047 = vmatprep.mubr.msk.f32.mxu1 %vm144_vm0, %v875_v2  ;;  %v90_v4 = vpop.permute.xlu0 %89 }
  0x9a   :  { %vm108_vm15 = vcmp.eq.s32.totalorder %v90_v4, %v1276_v39  ;;  %vm109_vm1 = vcmp.eq.s32.totalorder %v93_v3, %v1276_v39 }
  0x9b   :  { %v877_v6 = vsel %vm108_vm15, 1.0, %v1129_v15  ;;  %v878_v9 = vsel %vm109_vm1, 1.0, %v1129_v15 }
  0x9c   :  { %1020 = vmatmul.mubr.msk.f32.gmra.mxu0 %vm144_vm0, %v876_v5  ;;  %1048 = vmatmul.mubr.msk.f32.gmra.mxu1 %vm144_vm0, %v876_v5  ;;  %v500_v5 = vld [vmem:[%s1527_s0 + $0x78] sm:$0xff] }
  0x9d   :  { %1022 = vmatprep.mubr.msk.f32.mxu0 %vm144_vm0, %v877_v6  ;;  %1050 = vmatprep.mubr.msk.f32.mxu1 %vm144_vm0, %v877_v6  ;;  %v583_v7 = vpop.permute.xlu0 %582  ;;  %v586_v8 = vpop.permute.xlu1 %585  ;;  %v498_v6 = vld [vmem:[%s1527_s0 + $0x68] sm:$0xff] }
  0x9e   :  { %vm629_vm2 = vcmp.eq.s32.totalorder %v583_v7, %v1276_v39  ;;  %vm630_vm3 = vcmp.eq.s32.totalorder %v586_v8, %v1276_v39 }
  0x9f   :  { %v911_v10 = vsel %vm629_vm2, 1.0, %v1129_v15  ;;  %v912_v12 = vsel %vm630_vm3, 1.0, %v1129_v15  ;;  %vm1130_vm2 = vmmov 0  }
  0xa0   :  { %1023 = vmatmul.mubr.msk.f32.gmra.mxu0 %vm144_vm0, %v878_v9  ;;  %1051 = vmatmul.mubr.msk.f32.gmra.mxu1 %vm144_vm0, %v878_v9  ;;  %v499_v9 = vld [vmem:[%s1527_s0 + $0x70] sm:$0xff] }
  0xa1   :  { %678 = vxpose.xlu0.b32.start [1/16] (narrow) %v911_v10, 8  ;;  %v589_v11 = vpop.permute.xlu0 %588  ;;  %v592_v13 = vpop.permute.xlu1 %591  ;;  %1085 = vmatprep.mubr.msk.f32.mxu0 %vm1130_vm2, %v1129_v15  ;;  %v497_v10 = vld [vmem:[%s1527_s0 + $0x60] sm:$0xff] }
  0xa2   :  { %vm631_vm4 = vcmp.eq.s32.totalorder %v589_v11, %v1276_v39  ;;  %vm632_vm5 = vcmp.eq.s32.totalorder %v592_v13, %v1276_v39  ;;  %1120 = vmatprep.mubr.msk.f32.mxu1 %vm1130_vm2, %v1129_v15 }
  0xa3   :  { %v913_v14 = vsel %vm631_vm4, 1.0, %v1129_v15  ;;  %v914_v17 = vsel %vm632_vm5, 1.0, %v1129_v15 }
  0xa5   :  { %679 = vxpose.xlu0.b32.cont [2/16] (narrow) %v912_v12, 8  ;;  %v595_v16 = vpop.permute.xlu0 %594  ;;  %v598_v18 = vpop.permute.xlu1 %597 }
  0xa6   :  { %vm633_vm0 = vcmp.eq.s32.totalorder %v595_v16, %v1276_v39  ;;  %vm634_vm6 = vcmp.eq.s32.totalorder %v598_v18, %v1276_v39  ;;  %v496_v18 = vld [vmem:[%s1527_s0 + $0x58] sm:$0xff] }
  0xa7   :  { %v915_v19 = vsel %vm633_vm0, 1.0, %v1129_v15  ;;  %v916_v21 = vsel %vm634_vm6, 1.0, %v1129_v15 }
  0xa9   :  { %680 = vxpose.xlu0.b32.cont [3/16] (narrow) %v913_v14, 8  ;;  %v601_v20 = vpop.permute.xlu0 %600  ;;  %v604_v22 = vpop.permute.xlu1 %603 }
  0xaa   :  { %vm635_vm7 = vcmp.eq.s32.totalorder %v601_v20, %v1276_v39  ;;  %vm636_vm8 = vcmp.eq.s32.totalorder %v604_v22, %v1276_v39 }
  0xab   :  { %v917_v23 = vsel %vm635_vm7, 1.0, %v1129_v15  ;;  %v918_v25 = vsel %vm636_vm8, 1.0, %v1129_v15 }
  0xad   :  { %681 = vxpose.xlu0.b32.cont [4/16] (narrow) %v914_v17, 8  ;;  %v607_v24 = vpop.permute.xlu0 %606  ;;  %v610_v26 = vpop.permute.xlu1 %609 }
  0xae   :  { %vm637_vm9 = vcmp.eq.s32.totalorder %v607_v24, %v1276_v39  ;;  %vm638_vm10 = vcmp.eq.s32.totalorder %v610_v26, %v1276_v39  ;;  %v495_v24 = vld [vmem:[%s1527_s0 + $0x50] sm:$0xff] }
  0xaf   :  { %v919_v27 = vsel %vm637_vm9, 1.0, %v1129_v15  ;;  %v920_v29 = vsel %vm638_vm10, 1.0, %v1129_v15 }
  0xb1   :  { %682 = vxpose.xlu0.b32.cont [5/16] (narrow) %v915_v19, 8  ;;  %v613_v28 = vpop.permute.xlu0 %612  ;;  %v616_v30 = vpop.permute.xlu1 %615 }
  0xb2   :  { %vm639_vm11 = vcmp.eq.s32.totalorder %v613_v28, %v1276_v39  ;;  %vm640_vm12 = vcmp.eq.s32.totalorder %v616_v30, %v1276_v39 }
  0xb3   :  { %v921_v31 = vsel %vm639_vm11, 1.0, %v1129_v15  ;;  %v922_v33 = vsel %vm640_vm12, 1.0, %v1129_v15 }
  0xb5   :  { %683 = vxpose.xlu0.b32.cont [6/16] (narrow) %v916_v21, 8  ;;  %v619_v32 = vpop.permute.xlu0 %618  ;;  %v622_v34 = vpop.permute.xlu1 %621 }
  0xb6   :  { %vm641_vm13 = vcmp.eq.s32.totalorder %v619_v32, %v1276_v39  ;;  %vm642_vm14 = vcmp.eq.s32.totalorder %v622_v34, %v1276_v39  ;;  %v493_v34 = vld [vmem:[%s1527_s0 + $0x40] sm:$0xff] }
  0xb7   :  { %v923_v35 = vsel %vm641_vm13, 1.0, %v1129_v15  ;;  %v924_v37 = vsel %vm642_vm14, 1.0, %v1129_v15 }
  0xb9   :  { %684 = vxpose.xlu0.b32.cont [7/16] (narrow) %v917_v23, 8  ;;  %v625_v36 = vpop.permute.xlu0 %624  ;;  %v628_v38 = vpop.permute.xlu1 %627 }
  0xba   :  { %vm643_vm15 = vcmp.eq.s32.totalorder %v625_v36, %v1276_v39  ;;  %vm644_vm1 = vcmp.eq.s32.totalorder %v628_v38, %v1276_v39 }
  0xbb   :  { %v925_v40 = vsel %vm643_vm15, 1.0, %v1129_v15  ;;  %v926_v41 = vsel %vm644_vm1, 1.0, %v1129_v15 }
  0xbd   :  { %685 = vxpose.xlu0.b32.cont [8/16] (narrow) %v918_v25, 8 }
  0xc1   :  { %686 = vxpose.xlu0.b32.cont [9/16] (narrow) %v919_v27, 8 }
  0xc5   :  { %687 = vxpose.xlu0.b32.cont [10/16] (narrow) %v920_v29, 8  ;;  %v494_v29 = vld [vmem:[%s1527_s0 + $0x48] sm:$0xff] }
  0xc9   :  { %688 = vxpose.xlu0.b32.cont [11/16] (narrow) %v921_v31, 8 }
  0xcd   :  { %689 = vxpose.xlu0.b32.cont [12/16] (narrow) %v922_v33, 8 }
  0xd1   :  { %690 = vxpose.xlu0.b32.cont [13/16] (narrow) %v923_v35, 8 }
  0xd5   :  { %691 = vxpose.xlu0.b32.cont [14/16] (narrow) %v924_v37, 8 }
  0xd9   :  { %692 = vxpose.xlu0.b32.cont [15/16] (narrow) %v925_v40, 8  ;;  %v492_v40 = vld [vmem:[%s1527_s0 + $0x38] sm:$0xff] }
  0xdd   :  { %693 = vxpose.xlu0.b32.end [16/16] (narrow) %v926_v41, 8 }
 0x144   :  { %v1376_v42 = vpop.f32.mrf.mxu0  ;;  %v1378_v43 = vpop.f32.mrf.mxu1 }
 0x146   :  { %v1380_v44 = vpop.f32.mrf.mxu0  ;;  %v1382_v45 = vpop.f32.mrf.mxu1 }
 0x148   :  { %v1384_v46 = vpop.f32.mrf.mxu0  ;;  %v1386_v39 = vpop.f32.mrf.mxu1 }
 0x14a   :  { %v1388_v47 = vpop.f32.mrf.mxu0  ;;  %v1390_v48 = vpop.f32.mrf.mxu1 }
 0x14c   :  { %v1392_v49 = vpop.f32.mrf.mxu0  ;;  %v1394_v50 = vpop.f32.mrf.mxu1 }
 0x14e   :  { %v1396_v51 = vpop.f32.mrf.mxu0  ;;  %v1398_v52 = vpop.f32.mrf.mxu1 }
 0x150   :  { %v1400_v53 = vpop.f32.mrf.mxu0  ;;  %v1402_v54 = vpop.f32.mrf.mxu1 }
 0x152   :  { %v1404_v55 = vpop.f32.mrf.mxu0  ;;  %v1406_v56 = vpop.f32.mrf.mxu1 }
 0x154   :  { %v1015_v57 = vpop.f32.mrf.mxu0  ;;  %v1043_v58 = vpop.f32.mrf.mxu1 }
 0x155   :  { %v510_v38 = vsub.f32 %v494_v29, %v1015_v57  ;;  %v542_v41 = vsub.f32 %v1015_v57, %v1043_v58  ;;  %v508_v57 = vsub.f32 %v492_v40, %v1400_v53  ;;  %v490_v58 = vld [vmem:[%s1527_s0 + $0x28] sm:$0xff] }
 0x156   :  { %v1408_v59 = vpop.f32.mrf.mxu0  ;;  %v1410_v60 = vpop.f32.mrf.mxu1 }
 0x158   :  { %v1018_v61 = vpop.f32.mrf.mxu0  ;;  %v1046_v62 = vpop.f32.mrf.mxu1 }
 0x159   :  { %v512_v28 = vsub.f32 %v496_v18, %v1018_v61  ;;  %v544_v30 = vsub.f32 %v1018_v61, %v1046_v62 }
 0x15a   :  { %v309_v63 = vpop.f32.mrf.mxu0  ;;  %v456_v0 = vpop.f32.mrf.mxu1 }
 0x15b   :  { %v511_v33 = vsub.f32 %v495_v24, %v309_v63  ;;  %v543_v35 = vsub.f32 %v309_v63, %v456_v0  ;;  %v528_v61 = vmul.f32 %v512_v28, %v512_v28  ;;  %v560_v62 = vmul.f32 %v544_v30, %v544_v30  ;;  %v491_v0 = vld [vmem:[%s1527_s0 + $0x30] sm:$0xff] }
 0x15c   :  { %v1021_v1 = vpop.f32.mrf.mxu0  ;;  %v1049_v2 = vpop.f32.mrf.mxu1  ;;  %v509_v63 = vsub.f32 %v493_v34, %v1408_v59 }
 0x15d   :  { %v514_v13 = vsub.f32 %v498_v6, %v1021_v1  ;;  %v546_v14 = vsub.f32 %v1021_v1, %v1049_v2  ;;  %v541_v1 = vsub.f32 %v1408_v59, %v1410_v60  ;;  %v527_v2 = vmul.f32 %v511_v33, %v511_v33  ;;  %v489_v60 = vld [vmem:[%s1527_s0 + $0x20] sm:$0xff] }
 0x15e   :  { %v319_v3 = vpop.f32.mrf.mxu0  ;;  %v466_v4 = vpop.f32.mrf.mxu1  ;;  %v558_v6 = vmul.f32 %v542_v41, %v542_v41  ;;  %v507_v59 = vsub.f32 %v491_v0, %v1404_v55 }
 0x15f   :  { %v513_v23 = vsub.f32 %v497_v10, %v319_v3  ;;  %v545_v25 = vsub.f32 %v319_v3, %v466_v4  ;;  %v530_v31 = vmul.f32 %v514_v13, %v514_v13  ;;  %v562_v32 = vmul.f32 %v546_v14, %v546_v14 }
 0x160   :  { %v1024_v7 = vpop.f32.mrf.mxu0  ;;  %v1052_v8 = vpop.f32.mrf.mxu1  ;;  %v559_v3 = vmul.f32 %v543_v35, %v543_v35  ;;  %v540_v4 = vsub.f32 %v1400_v53, %v1402_v54  ;;  %v506_v53 = vsub.f32 %v490_v58, %v1392_v49  ;;  %v488_v54 = vld [vmem:[%s1527_s0 + $0x18] sm:$0xff]  ;;  %v538_v10 = vsub.f32 %v1392_v49, %v1394_v50  ;;  %v486_v50 = vld [vmem:[%s1527_s0 + $0x8] sm:$0xff] }
 0x161   :  { %v516_v11 = vsub.f32 %v500_v5, %v1024_v7  ;;  %v548_v12 = vsub.f32 %v1024_v7, %v1052_v8  ;;  %v529_v36 = vmul.f32 %v513_v23, %v513_v23  ;;  %v561_v37 = vmul.f32 %v545_v25, %v545_v25 }
 0x162   :  { %v329_v16 = vpop.f32.mrf.mxu0  ;;  %v476_v17 = vpop.f32.mrf.mxu1  ;;  %v526_v5 = vmul.f32 %v510_v38, %v510_v38  ;;  %v539_v7 = vsub.f32 %v1404_v55, %v1406_v56  ;;  %v525_v8 = vmul.f32 %v509_v63, %v509_v63  ;;  %v505_v55 = vsub.f32 %v489_v60, %v1396_v51  ;;  %v487_v56 = vld [vmem:[%s1527_s0 + $0x10] sm:$0xff] }
 0x163   :  { %v532_v19 = vmul.f32 %v516_v11, %v516_v11  ;;  %v564_v20 = vmul.f32 %v548_v12, %v548_v12  ;;  %v515_v21 = vsub.f32 %v499_v9, %v329_v16  ;;  %v547_v22 = vsub.f32 %v329_v16, %v476_v17 }
 0x164   :  { %v557_v9 = vmul.f32 %v541_v1, %v541_v1  ;;  %v524_v11 = vmul.f32 %v508_v57, %v508_v57  ;;  %v556_v12 = vmul.f32 %v540_v4, %v540_v4  ;;  %v537_v13 = vsub.f32 %v1396_v51, %v1398_v52  ;;  %v485_v52 = vld [vmem:[%s1527_s0] sm:$0xff] }
 0x165   :  { %v531_v26 = vmul.f32 %v515_v21, %v515_v21  ;;  %v563_v27 = vmul.f32 %v547_v22, %v547_v22  ;;  %1054 = vmatpush3.msra.mxu0 %v532_v19  ;;  %1089 = vmatpush3.msra.mxu1 %v564_v20  ;;  %v523_v14 = vmul.f32 %v507_v59, %v507_v59 }
 0x166   :  { %1055 = vmatprep.subr.mxu0 %v1129_v15  ;;  %1090 = vmatprep.subr.mxu1 %v1129_v15  ;;  %v555_v16 = vmul.f32 %v539_v7, %v539_v7  ;;  %v504_v49 = vsub.f32 %v488_v54, %v1384_v46  ;;  %v536_v17 = vsub.f32 %v1384_v46, %v1386_v39 }
 0x167   :  { %1056 = vmatpush3.msra.mxu0 %v531_v26  ;;  %1091 = vmatpush3.msra.mxu1 %v563_v27  ;;  %v522_v18 = vmul.f32 %v506_v53, %v506_v53  ;;  %v554_v19 = vmul.f32 %v538_v10, %v538_v10  ;;  %v503_v51 = vsub.f32 %v487_v56, %v1388_v47 }
 0x168   :  { %1057 = vmatprep.subr.mxu0 %v1129_v15  ;;  %1092 = vmatprep.subr.mxu1 %v1129_v15  ;;  %v535_v20 = vsub.f32 %v1388_v47, %v1390_v48  ;;  %v521_v21 = vmul.f32 %v505_v55, %v505_v55  ;;  %v553_v22 = vmul.f32 %v537_v13, %v537_v13 }
 0x169   :  { %1058 = vmatpush3.msra.mxu0 %v530_v31  ;;  %1093 = vmatpush3.msra.mxu1 %v562_v32  ;;  %v502_v46 = vsub.f32 %v486_v50, %v1376_v42  ;;  %v534_v39 = vsub.f32 %v1376_v42, %v1378_v43  ;;  %v520_v23 = vmul.f32 %v504_v49, %v504_v49 }
 0x16a   :  { %1059 = vmatprep.subr.mxu0 %v1129_v15  ;;  %1094 = vmatprep.subr.mxu1 %v1129_v15  ;;  %v552_v24 = vmul.f32 %v536_v17, %v536_v17  ;;  %v501_v25 = vsub.f32 %v485_v52, %v1380_v44  ;;  %v533_v47 = vsub.f32 %v1380_v44, %v1382_v45  ;;  %v694_v44 = vpop.trf.xlu0 }
 0x16b   :  { %1060 = vmatpush3.msra.mxu0 %v529_v36  ;;  %1095 = vmatpush3.msra.mxu1 %v561_v37  ;;  %v519_v48 = vmul.f32 %v503_v51, %v503_v51  ;;  %v551_v26 = vmul.f32 %v535_v20, %v535_v20  ;;  %v518_v42 = vmul.f32 %v502_v46, %v502_v46 }
 0x16c   :  { %1061 = vmatprep.subr.mxu0 %v1129_v15  ;;  %1096 = vmatprep.subr.mxu1 %v1129_v15  ;;  %v550_v43 = vmul.f32 %v534_v39, %v534_v39  ;;  %v517_v27 = vmul.f32 %v501_v25, %v501_v25  ;;  %v549_v28 = vmul.f32 %v533_v47, %v533_v47 }
 0x16d   :  { %1062 = vmatpush3.msra.mxu0 %v528_v61  ;;  %1097 = vmatpush3.msra.mxu1 %v560_v62 }
 0x16e   :  { %1063 = vmatprep.subr.mxu0 %v1129_v15  ;;  %1098 = vmatprep.subr.mxu1 %v1129_v15 }
 0x16f   :  { %1064 = vmatpush3.msra.mxu0 %v527_v2  ;;  %1099 = vmatpush3.msra.mxu1 %v559_v3 }
 0x170   :  { %1065 = vmatprep.subr.mxu0 %v1129_v15  ;;  %1100 = vmatprep.subr.mxu1 %v1129_v15 }
 0x171   :  { %1066 = vmatpush3.msra.mxu0 %v526_v5  ;;  %1101 = vmatpush3.msra.mxu1 %v558_v6 }
 0x172   :  { %1067 = vmatprep.subr.mxu0 %v1129_v15  ;;  %1102 = vmatprep.subr.mxu1 %v1129_v15 }
 0x173   :  { %1068 = vmatpush3.msra.mxu0 %v525_v8  ;;  %1103 = vmatpush3.msra.mxu1 %v557_v9 }
 0x174   :  { %1069 = vmatprep.subr.mxu0 %v1129_v15  ;;  %1104 = vmatprep.subr.mxu1 %v1129_v15 }
 0x175   :  { %1070 = vmatpush3.msra.mxu0 %v524_v11  ;;  %1105 = vmatpush3.msra.mxu1 %v556_v12 }
 0x176   :  { %1071 = vmatprep.subr.mxu0 %v1129_v15  ;;  %1106 = vmatprep.subr.mxu1 %v1129_v15 }
 0x177   :  { %1072 = vmatpush3.msra.mxu0 %v523_v14  ;;  %1107 = vmatpush3.msra.mxu1 %v555_v16 }
 0x178   :  { %1073 = vmatprep.subr.mxu0 %v1129_v15  ;;  %1108 = vmatprep.subr.mxu1 %v1129_v15 }
 0x179   :  { %1074 = vmatpush3.msra.mxu0 %v522_v18  ;;  %1109 = vmatpush3.msra.mxu1 %v554_v19 }
 0x17a   :  { %1075 = vmatprep.subr.mxu0 %v1129_v15  ;;  %1110 = vmatprep.subr.mxu1 %v1129_v15 }
 0x17b   :  { %1076 = vmatpush3.msra.mxu0 %v521_v21  ;;  %1111 = vmatpush3.msra.mxu1 %v553_v22 }
 0x17c   :  { %1077 = vmatprep.subr.mxu0 %v1129_v15  ;;  %1112 = vmatprep.subr.mxu1 %v1129_v15 }
 0x17d   :  { %1078 = vmatpush3.msra.mxu0 %v520_v23  ;;  %1113 = vmatpush3.msra.mxu1 %v552_v24 }
 0x17e   :  { %1079 = vmatprep.subr.mxu0 %v1129_v15  ;;  %1114 = vmatprep.subr.mxu1 %v1129_v15 }
 0x17f   :  { %1080 = vmatpush3.msra.mxu0 %v519_v48  ;;  %1115 = vmatpush3.msra.mxu1 %v551_v26 }
 0x180   :  { %1081 = vmatprep.subr.mxu0 %v1129_v15  ;;  %1116 = vmatprep.subr.mxu1 %v1129_v15 }
 0x181   :  { %1082 = vmatpush3.msra.mxu0 %v518_v42  ;;  %1117 = vmatpush3.msra.mxu1 %v550_v43 }
 0x182   :  { %1083 = vmatprep.subr.mxu0 %v1129_v15  ;;  %1118 = vmatprep.subr.mxu1 %v1129_v15 }
 0x183   :  { %1119 = vmatpush3.msra.mxu1 %v549_v28  ;;  %1084 = vmatpush3.msra.mxu0 %v517_v27 }
 0x184   :  { %1086 = vmatmul.mubr.f32.vlgmr.msra.gmra.mxu0 %v694_v44  ;;  %1121 = vmatmul.mubr.f32.vlgmr.msra.gmra.mxu1 %v694_v44 }
 0x244   :  { %v776_v45 = vpop.f32.mrf.mxu0  ;;  %v849_v29 = vpop.f32.mrf.mxu1 }
 0x245   :  { %781 = vst [vmem:[%s1528_s5] sm:$0xff] %v776_v45  ;;  %854 = vst [vmem:[%s1529_s6] sm:$0xff] %v849_v29 }
 0x246   :  { %v1087_v30 = vpop.f32.mrf.mxu0  ;;  %v1122_v31 = vpop.f32.mrf.mxu1 }

// kernel: gcn2_forward.13
= control target key start
LH: loop header
LB: loop body
LE: loop exit
PB: predicated region body
PF: predicated region fallthrough
CT: control target
= control target key end

     0   :  { %s586_s1 = inlined_call_operand.vmem [shape: bf16[128,128], index: 1, kind: input, shape index: {}]   ;;  %s587_s0 = inlined_call_operand.vmem [shape: bf16[128,128], index: 0, kind: input, shape index: {}]   ;;  %s588_s2 = inlined_call_operand.vmem [shape: f32[1,128], index: 2, kind: input, shape index: {}]   ;;  %s589_s3 = inlined_call_operand.vmem [shape: f32[128,128], index: 3, kind: output, shape index: {}]  }
   0x1   :  { %v451_v0 = vld [vmem:[%s586_s1 + $0x38] sm:$0xff]   ;;  %v452_v1 = vld [vmem:[%s586_s1 + $0x30] sm:$0xff]   ;;  %v453_v2 = vld [vmem:[%s586_s1 + $0x28] sm:$0xff]  }
   0x2   :  { %403 = vmatprep.subr.bf16.mxu0 %v451_v0  ;;  %435 = vmatprep.subr.bf16.mxu1 %v451_v0  ;;  %v454_v3 = vld [vmem:[%s586_s1 + $0x20] sm:$0xff]   ;;  %v455_v6 = vld [vmem:[%s586_s1 + $0x18] sm:$0xff]   ;;  %v456_v7 = vld [vmem:[%s586_s1 + $0x10] sm:$0xff]  }
   0x3   :  { %404 = vmatpush3.bf16.msra.mxu0 %v451_v0  ;;  %443 = vmatpush3.bf16.msra.mxu1 %v451_v0  ;;  %v459_v4 = vld [vmem:[%s587_s0] sm:$0xff]   ;;  %v457_v8 = vld [vmem:[%s586_s1 + $0x8] sm:$0xff]   ;;  %v463_v12 = vld [vmem:[%s587_s0 + $0x10] sm:$0xff]  }
   0x4   :  { %405 = vmatprep.subr.bf16.mxu0 %v452_v1  ;;  %436 = vmatprep.subr.bf16.mxu1 %v452_v1  ;;  %v460_v5 = vld [vmem:[%s587_s0 + $0x20] sm:$0xff]   ;;  %v461_v10 = vld [vmem:[%s587_s0 + $0x8] sm:$0xff]   ;;  %v464_v13 = vld [vmem:[%s587_s0 + $0x30] sm:$0xff]  }
   0x5   :  { %419 = vmatprep.mubr.bf16.mxu0 %v459_v4  ;;  %427 = vmatprep.mubr.bf16.mxu1 %v460_v5  ;;  %v458_v9 = vld [vmem:[%s586_s1] sm:$0xff]   ;;  %v462_v11 = vld [vmem:[%s587_s0 + $0x28] sm:$0xff]   ;;  %v465_v14 = vld [vmem:[%s587_s0 + $0x18] sm:$0xff]  }
   0x6   :  { %v466_v15 = vld [vmem:[%s587_s0 + $0x38] sm:$0xff]   ;;  %v386_v16 = vld [vmem:[%s588_s2] ss:$0 sm:$0xff] }
   0x7   :  { %406 = vmatpush3.bf16.msra.mxu0 %v452_v1  ;;  %444 = vmatpush3.bf16.msra.mxu1 %v452_v1 }
   0x8   :  { %407 = vmatprep.subr.bf16.mxu0 %v453_v2  ;;  %437 = vmatprep.subr.bf16.mxu1 %v453_v2 }
   0xb   :  { %408 = vmatpush3.bf16.msra.mxu0 %v453_v2  ;;  %445 = vmatpush3.bf16.msra.mxu1 %v453_v2 }
   0xc   :  { %409 = vmatprep.subr.bf16.mxu0 %v454_v3  ;;  %438 = vmatprep.subr.bf16.mxu1 %v454_v3 }
   0xf   :  { %410 = vmatpush3.bf16.msra.mxu0 %v454_v3  ;;  %446 = vmatpush3.bf16.msra.mxu1 %v454_v3 }
  0x10   :  { %411 = vmatprep.subr.bf16.mxu0 %v455_v6  ;;  %439 = vmatprep.subr.bf16.mxu1 %v455_v6 }
  0x13   :  { %412 = vmatpush3.bf16.msra.mxu0 %v455_v6  ;;  %447 = vmatpush3.bf16.msra.mxu1 %v455_v6 }
  0x14   :  { %413 = vmatprep.subr.bf16.mxu0 %v456_v7  ;;  %440 = vmatprep.subr.bf16.mxu1 %v456_v7 }
  0x17   :  { %414 = vmatpush3.bf16.msra.mxu0 %v456_v7  ;;  %448 = vmatpush3.bf16.msra.mxu1 %v456_v7 }
  0x18   :  { %415 = vmatprep.subr.bf16.mxu0 %v457_v8  ;;  %441 = vmatprep.subr.bf16.mxu1 %v457_v8 }
  0x1b   :  { %416 = vmatpush3.bf16.msra.mxu0 %v457_v8  ;;  %449 = vmatpush3.bf16.msra.mxu1 %v457_v8 }
  0x1c   :  { %417 = vmatprep.subr.bf16.mxu0 %v458_v9  ;;  %442 = vmatprep.subr.bf16.mxu1 %v458_v9 }
  0x1f   :  { %418 = vmatpush3.bf16.msra.mxu0 %v458_v9  ;;  %450 = vmatpush3.bf16.msra.mxu1 %v458_v9 }
  0x22   :  { %420 = vmatmul.mubr.bf16.vlgmr.msra.gmra.mxu0 %v461_v10  ;;  %428 = vmatmul.mubr.bf16.vlgmr.msra.gmra.mxu1 %v462_v11 }
  0x23   :  { %423 = vmatprep.mubr.bf16.mxu0 %v463_v12  ;;  %431 = vmatprep.mubr.bf16.mxu1 %v464_v13 }
  0x2a   :  { %424 = vmatmul.mubr.bf16.gmra.mxu0 %v465_v14  ;;  %432 = vmatmul.mubr.bf16.gmra.mxu1 %v466_v15 }
  0xe2   :  { %v421_v17 = vpop.f32.mrf.mxu0  ;;  %v429_v18 = vpop.f32.mrf.mxu1 }
  0xe3   :  { %v336_v19 = vadd.f32 %v421_v17, %v386_v16  ;;  %v344_v20 = vadd.f32 %v429_v18, %v386_v16 }
  0xe4   :  { %v213_v21 = vpop.f32.mrf.mxu0  ;;  %v245_v22 = vpop.f32.mrf.mxu1 }
  0xe5   :  { %352 = vst [vmem:[%s589_s3 + $0x10] sm:$0xff] %v336_v19  ;;  %360 = vst [vmem:[%s589_s3 + $0x50] sm:$0xff] %v344_v20  ;;  %v334_v23 = vadd.f32 %v386_v16, %v213_v21  ;;  %v342_v24 = vadd.f32 %v386_v16, %v245_v22 }
  0xe6   :  { %v422_v25 = vpop.f32.mrf.mxu0  ;;  %v430_v26 = vpop.f32.mrf.mxu1 }
  0xe7   :  { %350 = vst [vmem:[%s589_s3] sm:$0xff] %v334_v23  ;;  %358 = vst [vmem:[%s589_s3 + $0x40] sm:$0xff] %v342_v24  ;;  %v337_v27 = vadd.f32 %v422_v25, %v386_v16  ;;  %v345_v28 = vadd.f32 %v430_v26, %v386_v16 }
  0xe8   :  { %v216_v29 = vpop.f32.mrf.mxu0  ;;  %v248_v30 = vpop.f32.mrf.mxu1 }
  0xe9   :  { %353 = vst [vmem:[%s589_s3 + $0x18] sm:$0xff] %v337_v27  ;;  %361 = vst [vmem:[%s589_s3 + $0x58] sm:$0xff] %v345_v28  ;;  %v335_v31 = vadd.f32 %v386_v16, %v216_v29  ;;  %v343_v32 = vadd.f32 %v386_v16, %v248_v30 }
  0xea   :  { %v425_v33 = vpop.f32.mrf.mxu0  ;;  %v433_v34 = vpop.f32.mrf.mxu1 }
  0xeb   :  { %351 = vst [vmem:[%s589_s3 + $0x8] sm:$0xff] %v335_v31  ;;  %359 = vst [vmem:[%s589_s3 + $0x48] sm:$0xff] %v343_v32  ;;  %v340_v35 = vadd.f32 %v425_v33, %v386_v16  ;;  %v348_v36 = vadd.f32 %v433_v34, %v386_v16 }
  0xec   :  { %v229_v37 = vpop.f32.mrf.mxu0  ;;  %v261_v38 = vpop.f32.mrf.mxu1 }
  0xed   :  { %356 = vst [vmem:[%s589_s3 + $0x30] sm:$0xff] %v340_v35  ;;  %364 = vst [vmem:[%s589_s3 + $0x70] sm:$0xff] %v348_v36  ;;  %v338_v39 = vadd.f32 %v386_v16, %v229_v37  ;;  %v346_v40 = vadd.f32 %v386_v16, %v261_v38 }
  0xee   :  { %v426_v41 = vpop.f32.mrf.mxu0  ;;  %v434_v42 = vpop.f32.mrf.mxu1 }
  0xef   :  { %354 = vst [vmem:[%s589_s3 + $0x20] sm:$0xff] %v338_v39  ;;  %362 = vst [vmem:[%s589_s3 + $0x60] sm:$0xff] %v346_v40  ;;  %v341_v43 = vadd.f32 %v426_v41, %v386_v16  ;;  %v349_v44 = vadd.f32 %v434_v42, %v386_v16 }
  0xf0   :  { %v232_v45 = vpop.f32.mrf.mxu0  ;;  %v264_v46 = vpop.f32.mrf.mxu1 }
  0xf1   :  { %357 = vst [vmem:[%s589_s3 + $0x38] sm:$0xff] %v341_v43  ;;  %365 = vst [vmem:[%s589_s3 + $0x78] sm:$0xff] %v349_v44  ;;  %v339_v47 = vadd.f32 %v386_v16, %v232_v45  ;;  %v347_v48 = vadd.f32 %v386_v16, %v264_v46 }
  0xf3   :  { %355 = vst [vmem:[%s589_s3 + $0x28] sm:$0xff] %v339_v47  ;;  %363 = vst [vmem:[%s589_s3 + $0x68] sm:$0xff] %v347_v48 }

</bundles_post_ra>
